<compile_context>
chip_gen: v7x
topology: tpu7x:2x2x1
jax: 0.10.0
libtpu: 0.0.40
codegen_flags: <defaults>
</compile_context>

<pallas_src>
import functools
import math

import jax
import jax.numpy as jnp
from jax.experimental import pallas as pl
from jax.experimental.pallas import tpu as pltpu

EPS = 1e-6
_VMEM_LIMIT = 48 * 1024 * 1024   # > v5e's 16 MiB default, < v7x's 64 MiB physical


# ----------------------------------------------------------------------------
# helpers
# ----------------------------------------------------------------------------
def _row_tile(M, max_tm=512):
    """Pick a row-tile size for the M (=B*T) axis (largest divisor <= max_tm)."""
    if M <= max_tm:
        return M                      # single block == full dim (always legal)
    for tm in (512, 256, 128, 64, 32, 16, 8):
        if tm <= max_tm and M % tm == 0:
            return tm
    return min(max_tm, 512)           # ragged edge handled by Pallas padding/masking


def _ffn_row_tile(M, D, Dff):
    """Row tile for the fused LN+FFN kernel, budgeted so that the bf16 weights
    (double-buffered by the pipeline) plus the [TM, Dff] f32 ReLU intermediate and
    the double-buffered x/out tiles stay well inside v7x's 64 MiB VMEM."""
    budget = 40 * 1024 * 1024
    weights = 2 * (2 * D * Dff) * 2                 # w1 + w2, bf16, double-buffered
    per_row = 4 * Dff + 2 * 2 * 4 * D               # relu intermediate + 2x-buffered x/out
    avail = max(budget - weights, 8 * per_row)
    cap = max(8, min(512, (avail // per_row) // 8 * 8))
    return _row_tile(M, max_tm=cap)


def _ln_f32(x, a, b):
    """Reference LayerNorm: a*(x-mean)/(std+eps)+b with *unbiased* std (ddof=1).
    Exact division (no approx reciprocal) so it tracks the PyTorch reference closely."""
    d = x.shape[-1]
    mean = jnp.mean(x, axis=-1, keepdims=True)
    var = jnp.sum((x - mean) ** 2, axis=-1, keepdims=True) * (1.0 / (d - 1))
    return a * (x - mean) / (jnp.sqrt(var) + EPS) + b


# ----------------------------------------------------------------------------
# Pallas kernels
# ----------------------------------------------------------------------------
def _ln_qkv_kernel(x_ref, a_ref, b_ref, w_ref, bias_ref, o_ref):
    # fused: y = LayerNorm(x); o = (y @ Wqkv + bqkv) in bf16   (Wqkv is bf16 [D, 3D])
    y = _ln_f32(x_ref[...], a_ref[...], b_ref[...])
    o_ref[...] = (
        jnp.dot(y.astype(jnp.bfloat16), w_ref[...], preferred_element_type=jnp.float32)
        + bias_ref[...]
    ).astype(jnp.bfloat16)


def _attention_kernel(qkv_ref, bias_ref, res_ref, wo_ref, bo_ref, o_ref, *, num_heads):
    # One batch element per grid step.  Fused: softmax(QK^T/sqrt(dk)+mask_bias) V,
    # then out-projection + bias + residual — all heads accumulated directly into a
    # [T, D] f32 accumulator (no concat; per-head live set stays small).
    #   qkv_ref: [1, T, 3D] bf16   bias_ref: [1, 1, T] f32 (additive mask bias)
    #   res_ref: [1, T, D] f32     wo_ref: [D, D] bf16     bo_ref: [1, D] f32
    # TODO(synk): for long T convert to an online-softmax (flash) loop over key tiles
    #             and add a 2nd parallel grid axis (query tiles / head groups) so both
    #             v7x TensorCores stay busy; dk-grouped (128-lane) slicing would also
    #             improve MXU fill on v6e/v7x.
    T = qkv_ref.shape[1]
    D = qkv_ref.shape[2] // 3
    dk = D // num_heads
    scale = 1.0 / math.sqrt(dk)

    qkv = qkv_ref[0]            # [T, 3D] bf16
    bias = bias_ref[0]          # [1, T]  f32, broadcasts over query rows
    acc = res_ref[0] + bo_ref[...]          # start from residual + out-proj bias

    for h in range(num_heads):  # static unrolled head loop
        q = qkv[:, h * dk:(h + 1) * dk]                       # [T, dk] bf16
        k = qkv[:, D + h * dk:D + (h + 1) * dk]               # [T, dk] bf16
        v = qkv[:, 2 * D + h * dk:2 * D + (h + 1) * dk]       # [T, dk] bf16
        # contract last dims directly (no .T materialization; MXU handles it)
        s = jax.lax.dot_general(
            q, k, (((1,), (1,)), ((), ())), preferred_element_type=jnp.float32
        ) * scale + bias                                       # [T, T] f32
        m = jnp.max(s, axis=-1, keepdims=True)
        p = jnp.exp(s - m)
        p = p * pl.reciprocal(jnp.sum(p, axis=-1, keepdims=True), approx=True)
        head = jnp.dot(p.astype(jnp.bfloat16), v,
                       preferred_element_type=jnp.float32)     # [T, dk] f32
        # fold this head straight into the output projection accumulator
        acc = acc + jnp.dot(head.astype(jnp.bfloat16),
                            wo_ref[h * dk:(h + 1) * dk, :],
                            preferred_element_type=jnp.float32)
    o_ref[0] = acc              # lane-dense [T, D] f32 store (residual stream)


def _ln_ffn_residual_kernel(x_ref, a_ref, b_ref, w1_ref, b1_ref, w2_ref, b2_ref, o_ref):
    # fused: y = LN(x); h = relu(y@W1+b1); o = h@W2 + b2 + x
    x = x_ref[...]
    y = _ln_f32(x, a_ref[...], b_ref[...])
    h = (
        jnp.dot(y.astype(jnp.bfloat16), w1_ref[...], preferred_element_type=jnp.float32)
        + b1_ref[...]
    )
    h = jnp.maximum(h, 0.0)
    o_ref[...] = (
        jnp.dot(h.astype(jnp.bfloat16), w2_ref[...], preferred_element_type=jnp.float32)
        + b2_ref[...]
        + x
    )


def _layernorm_kernel(x_ref, a_ref, b_ref, o_ref):
    o_ref[...] = _ln_f32(x_ref[...], a_ref[...], b_ref[...])


# ----------------------------------------------------------------------------
# pallas_call wrappers (M-axis tiled, weights resident, megacore-parallel)
# ----------------------------------------------------------------------------
_PARALLEL = pltpu.CompilerParams(
    dimension_semantics=("parallel",), vmem_limit_bytes=_VMEM_LIMIT
)


def ln_qkv_proj(x2d, a, b, wqkv, bqkv):
    M, D = x2d.shape
    N = wqkv.shape[1]
    TM = _row_tile(M)
    # TODO(synk): constant-index weight specs could use pipeline_mode=pl.Buffered(1)
    #             to halve their VMEM footprint on v7x.
    return pl.pallas_call(
        _ln_qkv_kernel,
        out_shape=jax.ShapeDtypeStruct((M, N), jnp.bfloat16),
        grid=(pl.cdiv(M, TM),),
        in_specs=[
            pl.BlockSpec((TM, D), lambda i: (i, 0)),
            pl.BlockSpec((1, D), lambda i: (0, 0)),
            pl.BlockSpec((1, D), lambda i: (0, 0)),
            pl.BlockSpec((D, N), lambda i: (0, 0)),   # weights stay VMEM-resident
            pl.BlockSpec((1, N), lambda i: (0, 0)),
        ],
        out_specs=pl.BlockSpec((TM, N), lambda i: (i, 0)),
        compiler_params=_PARALLEL,
        cost_estimate=pl.CostEstimate(
            flops=2 * M * D * N, transcendentals=0,
            bytes_accessed=4 * M * D + 2 * D * N + 4 * N + 2 * M * N),
    )(x2d, a, b, wqkv, bqkv)


def self_attention(qkv3, mask_bias, residual, wo, bo, num_heads):
    # qkv3: [B, T, 3D] bf16, mask_bias: [B, 1, T] f32, residual: [B, T, D] f32
    # -> [B, T, D] f32  (attention + out-projection + bias + residual, fused)
    B, T, N3 = qkv3.shape
    D = N3 // 3
    kernel = functools.partial(_attention_kernel, num_heads=num_heads)
    return pl.pallas_call(
        kernel,
        out_shape=jax.ShapeDtypeStruct((B, T, D), jnp.float32),
        grid=(B,),
        in_specs=[
            pl.BlockSpec((1, T, N3), lambda b: (b, 0, 0)),
            pl.BlockSpec((1, 1, T), lambda b: (b, 0, 0)),    # additive mask bias row
            pl.BlockSpec((1, T, D), lambda b: (b, 0, 0)),    # residual
            pl.BlockSpec((D, D), lambda b: (0, 0)),          # Wo resident
            pl.BlockSpec((1, D), lambda b: (0, 0)),
        ],
        out_specs=pl.BlockSpec((1, T, D), lambda b: (b, 0, 0)),
        input_output_aliases={2: 0},                          # write residual in place
        compiler_params=_PARALLEL,
        cost_estimate=pl.CostEstimate(
            flops=4 * B * T * T * D + 2 * B * T * D * D,
            transcendentals=B * num_heads * T * T,
            bytes_accessed=2 * B * T * N3 + 8 * B * T * D + 4 * B * T + 2 * D * D),
    )(qkv3, mask_bias, residual, wo, bo)


def ln_ffn_residual(x2d, a, b, w1, b1, w2, b2):
    M, D = x2d.shape
    Dff = w1.shape[1]
    TM = _ffn_row_tile(M, D, Dff)   # VMEM-budgeted (ReLU intermediate + weights)
    return pl.pallas_call(
        _ln_ffn_residual_kernel,
        out_shape=jax.ShapeDtypeStruct((M, D), jnp.float32),
        grid=(pl.cdiv(M, TM),),
        in_specs=[
            pl.BlockSpec((TM, D), lambda i: (i, 0)),
            pl.BlockSpec((1, D), lambda i: (0, 0)),
            pl.BlockSpec((1, D), lambda i: (0, 0)),
            pl.BlockSpec((D, Dff), lambda i: (0, 0)),
            pl.BlockSpec((1, Dff), lambda i: (0, 0)),
            pl.BlockSpec((Dff, D), lambda i: (0, 0)),
            pl.BlockSpec((1, D), lambda i: (0, 0)),
        ],
        out_specs=pl.BlockSpec((TM, D), lambda i: (i, 0)),
        input_output_aliases={0: 0},                          # residual stream in place
        compiler_params=_PARALLEL,
        cost_estimate=pl.CostEstimate(
            flops=4 * M * D * Dff, transcendentals=0,
            bytes_accessed=8 * M * D + 4 * D * Dff),
    )(x2d, a, b, w1, b1, w2, b2)


def layer_norm(x2d, a, b):
    M, D = x2d.shape
    TM = _row_tile(M)
    return pl.pallas_call(
        _layernorm_kernel,
        out_shape=jax.ShapeDtypeStruct((M, D), jnp.float32),
        grid=(pl.cdiv(M, TM),),
        in_specs=[
            pl.BlockSpec((TM, D), lambda i: (i, 0)),
            pl.BlockSpec((1, D), lambda i: (0, 0)),
            pl.BlockSpec((1, D), lambda i: (0, 0)),
        ],
        out_specs=pl.BlockSpec((TM, D), lambda i: (i, 0)),
        compiler_params=_PARALLEL,
    )(x2d, a, b)


# ----------------------------------------------------------------------------
# Module glue (Encoder.forward semantics)
# ----------------------------------------------------------------------------
def encoder_layer(lp, x2d, shape_btd, mask_bias, num_heads):
    B, T, D = shape_btd
    M = B * T
    # sublayer 0: x + proj(self_attn(norm(x)))   [LN+QKV fused; attn+out-proj+residual fused]
    qkv = ln_qkv_proj(x2d, lp["ln0_a"], lp["ln0_b"], lp["wqkv"], lp["bqkv"])   # bf16 [M,3D]
    x_btd = self_attention(qkv.reshape(B, T, 3 * D), mask_bias,
                           x2d.reshape(B, T, D), lp["wo"], lp["bo"], num_heads)
    x2d = x_btd.reshape(M, D)
    # sublayer 1: x + ffn(norm(x))               [LN + FFN + residual fused]
    x2d = ln_ffn_residual(x2d, lp["ln1_a"], lp["ln1_b"],
                          lp["w1"], lp["b1"], lp["w2"], lp["b2"])
    return x2d


@functools.partial(jax.jit, static_argnames=("num_heads",))
def encoder_forward(params, x, mask, *, num_heads):
    B, T, D = x.shape
    M = B * T
    # hoist the key-padding mask to a single additive bias, computed once per forward
    keep = jnp.broadcast_to(mask, (B, 1, T)) != 0
    mask_bias = jnp.where(keep, 0.0, -1e9).astype(jnp.float32)   # [B, 1, T]
    x2d = x.reshape(M, D).astype(jnp.float32)
    for lp in params["layers"]:
        x2d = encoder_layer(lp, x2d, (B, T, D), mask_bias, num_heads)
    # final Encoder.norm
    return layer_norm(x2d, params["norm_a"], params["norm_b"]).reshape(B, T, D)


# ----------------------------------------------------------------------------
# Deterministic parameter construction
# ----------------------------------------------------------------------------
def _init_linear(key, fan_in, fan_out):
    kw, kb = jax.random.split(key)
    w = jax.random.normal(kw, (fan_in, fan_out), jnp.float32) * 0.02
    b = jax.random.normal(kb, (1, fan_out), jnp.float32) * 0.02
    return w, b


def init_params(key, n_layers, d_model, d_ff):
    layers = []
    for _ in range(n_layers):
        keys = jax.random.split(key, 8)
        key = keys[-1]
        wq, bq = _init_linear(keys[0], d_model, d_model)
        wk, bk = _init_linear(keys[1], d_model, d_model)
        wv, bv = _init_linear(keys[2], d_model, d_model)
        wo, bo = _init_linear(keys[3], d_model, d_model)
        w1, b1 = _init_linear(keys[4], d_model, d_ff)
        w2, b2 = _init_linear(keys[5], d_ff, d_model)
        layers.append(
            dict(
                # fused QKV projection weight (bf16 for the MXU; f32 accumulation)
                wqkv=jnp.concatenate([wq, wk, wv], axis=1).astype(jnp.bfloat16),
                bqkv=jnp.concatenate([bq, bk, bv], axis=1),
                wo=wo.astype(jnp.bfloat16), bo=bo,
                w1=w1.astype(jnp.bfloat16), b1=b1,
                w2=w2.astype(jnp.bfloat16), b2=b2,
                # LayerNorm params follow the module __init__: ones / zeros
                ln0_a=jnp.ones((1, d_model), jnp.float32),
                ln0_b=jnp.zeros((1, d_model), jnp.float32),
                ln1_a=jnp.ones((1, d_model), jnp.float32),
                ln1_b=jnp.zeros((1, d_model), jnp.float32),
            )
        )
    return dict(
        layers=layers,
        norm_a=jnp.ones((1, d_model), jnp.float32),
        norm_b=jnp.zeros((1, d_model), jnp.float32),
    )


if __name__ == "__main__":
    B, T = 2, 8
    D_MODEL, N_HEADS, D_FF, N_LAYERS = 32, 4, 64, 2

    root = jax.random.PRNGKey(0)
    k_x, k_p = jax.random.split(root, 2)

    x = jax.random.normal(k_x, (B, T, D_MODEL), jnp.float32)
    # Encoder mask: per-batch key padding mask [B, 1, T] (1 = keep, 0 = pad)
    mask = jnp.ones((B, 1, T), jnp.float32)
    mask = mask.at[1, 0, T - 2:].set(0.0)

    params = init_params(k_p, N_LAYERS, D_MODEL, D_FF)

    out = encoder_forward(params, x, mask, num_heads=N_HEADS)
    out = jax.block_until_ready(out)
    assert out.shape == (B, T, D_MODEL)
    assert bool(jnp.all(jnp.isfinite(out)))
    print("KERNEL_OK")
</pallas_src>

<mosaic_0001>
module attributes {stable_mosaic.version = 11 : i64} {
  func.func @_attention_kernel(%arg0: i32, %arg1: memref<1x8x96xbf16, #tpu.memory_space<vmem>>, %arg2: memref<1x1x8xf32, #tpu.memory_space<vmem>>, %arg3: memref<1x8x32xf32, #tpu.memory_space<vmem>>, %arg4: memref<32x32xbf16, #tpu.memory_space<vmem>>, %arg5: memref<1x32xf32, #tpu.memory_space<vmem>>, %arg6: memref<1x8x32xf32, #tpu.memory_space<vmem>>) attributes {dimension_semantics = [#tpu.dimension_semantics<parallel>], iteration_bounds = array<i64: 2>, scalar_prefetch = 0 : i64, scratch_operands = 0 : i64, tpu.core_type = #tpu.core_type<tc>, window_params = [{transform_indices = @transform_0, window_bounds = array<i64: 1, 8, 96>}, {transform_indices = @transform_1, window_bounds = array<i64: 1, 1, 8>}, {transform_indices = @transform_2, window_bounds = array<i64: 1, 8, 32>}, {pipeline_mode = #tpu.pipeline_mode<synchronous>, transform_indices = @transform_3, window_bounds = array<i64: 32, 32>}, {pipeline_mode = #tpu.pipeline_mode<synchronous>, transform_indices = @transform_4, window_bounds = array<i64: 1, 32>}, {transform_indices = @transform_5, window_bounds = array<i64: 1, 8, 32>}]} {
    %c0 = arith.constant 0 : index
    %c0_0 = arith.constant 0 : index
    %c0_1 = arith.constant 0 : index
    %0 = vector.load %arg1[%c0, %c0_0, %c0_1] : memref<1x8x96xbf16, #tpu.memory_space<vmem>>, vector<1x8x96xbf16>
    %1 = vector.shape_cast %0 : vector<1x8x96xbf16> to vector<8x96xbf16>
    %c0_2 = arith.constant 0 : index
    %c0_3 = arith.constant 0 : index
    %c0_4 = arith.constant 0 : index
    %2 = vector.load %arg2[%c0_2, %c0_3, %c0_4] : memref<1x1x8xf32, #tpu.memory_space<vmem>>, vector<1x1x8xf32>
    %3 = vector.shape_cast %2 : vector<1x1x8xf32> to vector<1x8xf32>
    %c0_5 = arith.constant 0 : index
    %c0_6 = arith.constant 0 : index
    %c0_7 = arith.constant 0 : index
    %4 = vector.load %arg3[%c0_5, %c0_6, %c0_7] : memref<1x8x32xf32, #tpu.memory_space<vmem>>, vector<1x8x32xf32>
    %5 = vector.shape_cast %4 : vector<1x8x32xf32> to vector<8x32xf32>
    %c0_8 = arith.constant 0 : index
    %c0_9 = arith.constant 0 : index
    %6 = vector.load %arg5[%c0_8, %c0_9] : memref<1x32xf32, #tpu.memory_space<vmem>>, vector<1x32xf32>
    %7 = vector.broadcast %6 : vector<1x32xf32> to vector<8x32xf32>
    %8 = arith.addf %5, %7 : vector<8x32xf32>
    %9 = vector.extract_strided_slice %1 {offsets = [0, 0], sizes = [8, 8], strides = [1, 1]} : vector<8x96xbf16> to vector<8x8xbf16>
    %10 = vector.extract_strided_slice %1 {offsets = [0, 32], sizes = [8, 8], strides = [1, 1]} : vector<8x96xbf16> to vector<8x8xbf16>
    %11 = vector.extract_strided_slice %1 {offsets = [0, 64], sizes = [8, 8], strides = [1, 1]} : vector<8x96xbf16> to vector<8x8xbf16>
    %cst = arith.constant dense<0.000000e+00> : vector<8x8xf32>
    %12 = tpu.matmul %9, %10, %cst {dimension_numbers = #tpu.dot_dimension_numbers<[1], [1], [0], [0], [0, 0, 1, 0], [], []>} : vector<8x8xbf16>, vector<8x8xbf16>, vector<8x8xf32> -> vector<8x8xf32>
    %cst_10 = arith.constant 0.353553385 : f32
    %13 = vector.broadcast %cst_10 : f32 to vector<8x8xf32>
    %14 = arith.mulf %12, %13 : vector<8x8xf32>
    %15 = vector.broadcast %3 : vector<1x8xf32> to vector<8x8xf32>
    %16 = arith.addf %14, %15 : vector<8x8xf32>
    %cst_11 = arith.constant dense<0xFF800000> : vector<8xf32>
    %17 = vector.multi_reduction <maximumf>, %16, %cst_11 [1] : vector<8x8xf32> to vector<8xf32>
    %18 = vector.shape_cast %17 : vector<8xf32> to vector<8x1xf32>
    %19 = vector.broadcast %18 : vector<8x1xf32> to vector<8x8xf32>
    %20 = arith.subf %16, %19 : vector<8x8xf32>
    %21 = math.exp %20 : vector<8x8xf32>
    %cst_12 = arith.constant dense<0.000000e+00> : vector<8xf32>
    %22 = vector.multi_reduction <add>, %21, %cst_12 [1] : vector<8x8xf32> to vector<8xf32>
    %23 = vector.shape_cast %22 : vector<8xf32> to vector<8x1xf32>
    %24 = tpu.reciprocal %23 {approx = true} : vector<8x1xf32> -> vector<8x1xf32>
    %25 = vector.broadcast %24 : vector<8x1xf32> to vector<8x8xf32>
    %26 = arith.mulf %21, %25 : vector<8x8xf32>
    %27 = arith.truncf %26 : vector<8x8xf32> to vector<8x8xbf16>
    %cst_13 = arith.constant dense<0.000000e+00> : vector<8x8xf32>
    %28 = tpu.matmul %27, %11, %cst_13 {dimension_numbers = #tpu.dot_dimension_numbers<[1], [0], [0], [1], [0, 0, 1, 1], [], []>} : vector<8x8xbf16>, vector<8x8xbf16>, vector<8x8xf32> -> vector<8x8xf32>
    %29 = arith.truncf %28 : vector<8x8xf32> to vector<8x8xbf16>
    %c0_14 = arith.constant 0 : index
    %c0_15 = arith.constant 0 : index
    %30 = vector.load %arg4[%c0_14, %c0_15] : memref<32x32xbf16, #tpu.memory_space<vmem>>, vector<8x32xbf16>
    %cst_16 = arith.constant dense<0.000000e+00> : vector<8x32xf32>
    %31 = tpu.matmul %29, %30, %cst_16 {dimension_numbers = #tpu.dot_dimension_numbers<[1], [0], [0], [1], [0, 0, 1, 1], [], []>} : vector<8x8xbf16>, vector<8x32xbf16>, vector<8x32xf32> -> vector<8x32xf32>
    %32 = arith.addf %8, %31 : vector<8x32xf32>
    %33 = vector.extract_strided_slice %1 {offsets = [0, 8], sizes = [8, 8], strides = [1, 1]} : vector<8x96xbf16> to vector<8x8xbf16>
    %34 = vector.extract_strided_slice %1 {offsets = [0, 40], sizes = [8, 8], strides = [1, 1]} : vector<8x96xbf16> to vector<8x8xbf16>
    %35 = vector.extract_strided_slice %1 {offsets = [0, 72], sizes = [8, 8], strides = [1, 1]} : vector<8x96xbf16> to vector<8x8xbf16>
    %cst_17 = arith.constant dense<0.000000e+00> : vector<8x8xf32>
    %36 = tpu.matmul %33, %34, %cst_17 {dimension_numbers = #tpu.dot_dimension_numbers<[1], [1], [0], [0], [0, 0, 1, 0], [], []>} : vector<8x8xbf16>, vector<8x8xbf16>, vector<8x8xf32> -> vector<8x8xf32>
    %cst_18 = arith.constant 0.353553385 : f32
    %37 = vector.broadcast %cst_18 : f32 to vector<8x8xf32>
    %38 = arith.mulf %36, %37 : vector<8x8xf32>
    %39 = vector.broadcast %3 : vector<1x8xf32> to vector<8x8xf32>
    %40 = arith.addf %38, %39 : vector<8x8xf32>
    %cst_19 = arith.constant dense<0xFF800000> : vector<8xf32>
    %41 = vector.multi_reduction <maximumf>, %40, %cst_19 [1] : vector<8x8xf32> to vector<8xf32>
    %42 = vector.shape_cast %41 : vector<8xf32> to vector<8x1xf32>
    %43 = vector.broadcast %42 : vector<8x1xf32> to vector<8x8xf32>
    %44 = arith.subf %40, %43 : vector<8x8xf32>
    %45 = math.exp %44 : vector<8x8xf32>
    %cst_20 = arith.constant dense<0.000000e+00> : vector<8xf32>
    %46 = vector.multi_reduction <add>, %45, %cst_20 [1] : vector<8x8xf32> to vector<8xf32>
    %47 = vector.shape_cast %46 : vector<8xf32> to vector<8x1xf32>
    %48 = tpu.reciprocal %47 {approx = true} : vector<8x1xf32> -> vector<8x1xf32>
    %49 = vector.broadcast %48 : vector<8x1xf32> to vector<8x8xf32>
    %50 = arith.mulf %45, %49 : vector<8x8xf32>
    %51 = arith.truncf %50 : vector<8x8xf32> to vector<8x8xbf16>
    %cst_21 = arith.constant dense<0.000000e+00> : vector<8x8xf32>
    %52 = tpu.matmul %51, %35, %cst_21 {dimension_numbers = #tpu.dot_dimension_numbers<[1], [0], [0], [1], [0, 0, 1, 1], [], []>} : vector<8x8xbf16>, vector<8x8xbf16>, vector<8x8xf32> -> vector<8x8xf32>
    %53 = arith.truncf %52 : vector<8x8xf32> to vector<8x8xbf16>
    %c8 = arith.constant 8 : index
    %c0_22 = arith.constant 0 : index
    %54 = vector.load %arg4[%c8, %c0_22] : memref<32x32xbf16, #tpu.memory_space<vmem>>, vector<8x32xbf16>
    %cst_23 = arith.constant dense<0.000000e+00> : vector<8x32xf32>
    %55 = tpu.matmul %53, %54, %cst_23 {dimension_numbers = #tpu.dot_dimension_numbers<[1], [0], [0], [1], [0, 0, 1, 1], [], []>} : vector<8x8xbf16>, vector<8x32xbf16>, vector<8x32xf32> -> vector<8x32xf32>
    %56 = arith.addf %32, %55 : vector<8x32xf32>
    %57 = vector.extract_strided_slice %1 {offsets = [0, 16], sizes = [8, 8], strides = [1, 1]} : vector<8x96xbf16> to vector<8x8xbf16>
    %58 = vector.extract_strided_slice %1 {offsets = [0, 48], sizes = [8, 8], strides = [1, 1]} : vector<8x96xbf16> to vector<8x8xbf16>
    %59 = vector.extract_strided_slice %1 {offsets = [0, 80], sizes = [8, 8], strides = [1, 1]} : vector<8x96xbf16> to vector<8x8xbf16>
    %cst_24 = arith.constant dense<0.000000e+00> : vector<8x8xf32>
    %60 = tpu.matmul %57, %58, %cst_24 {dimension_numbers = #tpu.dot_dimension_numbers<[1], [1], [0], [0], [0, 0, 1, 0], [], []>} : vector<8x8xbf16>, vector<8x8xbf16>, vector<8x8xf32> -> vector<8x8xf32>
    %cst_25 = arith.constant 0.353553385 : f32
    %61 = vector.broadcast %cst_25 : f32 to vector<8x8xf32>
    %62 = arith.mulf %60, %61 : vector<8x8xf32>
    %63 = vector.broadcast %3 : vector<1x8xf32> to vector<8x8xf32>
    %64 = arith.addf %62, %63 : vector<8x8xf32>
    %cst_26 = arith.constant dense<0xFF800000> : vector<8xf32>
    %65 = vector.multi_reduction <maximumf>, %64, %cst_26 [1] : vector<8x8xf32> to vector<8xf32>
    %66 = vector.shape_cast %65 : vector<8xf32> to vector<8x1xf32>
    %67 = vector.broadcast %66 : vector<8x1xf32> to vector<8x8xf32>
    %68 = arith.subf %64, %67 : vector<8x8xf32>
    %69 = math.exp %68 : vector<8x8xf32>
    %cst_27 = arith.constant dense<0.000000e+00> : vector<8xf32>
    %70 = vector.multi_reduction <add>, %69, %cst_27 [1] : vector<8x8xf32> to vector<8xf32>
    %71 = vector.shape_cast %70 : vector<8xf32> to vector<8x1xf32>
    %72 = tpu.reciprocal %71 {approx = true} : vector<8x1xf32> -> vector<8x1xf32>
    %73 = vector.broadcast %72 : vector<8x1xf32> to vector<8x8xf32>
    %74 = arith.mulf %69, %73 : vector<8x8xf32>
    %75 = arith.truncf %74 : vector<8x8xf32> to vector<8x8xbf16>
    %cst_28 = arith.constant dense<0.000000e+00> : vector<8x8xf32>
    %76 = tpu.matmul %75, %59, %cst_28 {dimension_numbers = #tpu.dot_dimension_numbers<[1], [0], [0], [1], [0, 0, 1, 1], [], []>} : vector<8x8xbf16>, vector<8x8xbf16>, vector<8x8xf32> -> vector<8x8xf32>
    %77 = arith.truncf %76 : vector<8x8xf32> to vector<8x8xbf16>
    %c16 = arith.constant 16 : index
    %c0_29 = arith.constant 0 : index
    %78 = vector.load %arg4[%c16, %c0_29] : memref<32x32xbf16, #tpu.memory_space<vmem>>, vector<8x32xbf16>
    %cst_30 = arith.constant dense<0.000000e+00> : vector<8x32xf32>
    %79 = tpu.matmul %77, %78, %cst_30 {dimension_numbers = #tpu.dot_dimension_numbers<[1], [0], [0], [1], [0, 0, 1, 1], [], []>} : vector<8x8xbf16>, vector<8x32xbf16>, vector<8x32xf32> -> vector<8x32xf32>
    %80 = arith.addf %56, %79 : vector<8x32xf32>
    %81 = vector.extract_strided_slice %1 {offsets = [0, 24], sizes = [8, 8], strides = [1, 1]} : vector<8x96xbf16> to vector<8x8xbf16>
    %82 = vector.extract_strided_slice %1 {offsets = [0, 56], sizes = [8, 8], strides = [1, 1]} : vector<8x96xbf16> to vector<8x8xbf16>
    %83 = vector.extract_strided_slice %1 {offsets = [0, 88], sizes = [8, 8], strides = [1, 1]} : vector<8x96xbf16> to vector<8x8xbf16>
    %cst_31 = arith.constant dense<0.000000e+00> : vector<8x8xf32>
    %84 = tpu.matmul %81, %82, %cst_31 {dimension_numbers = #tpu.dot_dimension_numbers<[1], [1], [0], [0], [0, 0, 1, 0], [], []>} : vector<8x8xbf16>, vector<8x8xbf16>, vector<8x8xf32> -> vector<8x8xf32>
    %cst_32 = arith.constant 0.353553385 : f32
    %85 = vector.broadcast %cst_32 : f32 to vector<8x8xf32>
    %86 = arith.mulf %84, %85 : vector<8x8xf32>
    %87 = vector.broadcast %3 : vector<1x8xf32> to vector<8x8xf32>
    %88 = arith.addf %86, %87 : vector<8x8xf32>
    %cst_33 = arith.constant dense<0xFF800000> : vector<8xf32>
    %89 = vector.multi_reduction <maximumf>, %88, %cst_33 [1] : vector<8x8xf32> to vector<8xf32>
    %90 = vector.shape_cast %89 : vector<8xf32> to vector<8x1xf32>
    %91 = vector.broadcast %90 : vector<8x1xf32> to vector<8x8xf32>
    %92 = arith.subf %88, %91 : vector<8x8xf32>
    %93 = math.exp %92 : vector<8x8xf32>
    %cst_34 = arith.constant dense<0.000000e+00> : vector<8xf32>
    %94 = vector.multi_reduction <add>, %93, %cst_34 [1] : vector<8x8xf32> to vector<8xf32>
    %95 = vector.shape_cast %94 : vector<8xf32> to vector<8x1xf32>
    %96 = tpu.reciprocal %95 {approx = true} : vector<8x1xf32> -> vector<8x1xf32>
    %97 = vector.broadcast %96 : vector<8x1xf32> to vector<8x8xf32>
    %98 = arith.mulf %93, %97 : vector<8x8xf32>
    %99 = arith.truncf %98 : vector<8x8xf32> to vector<8x8xbf16>
    %cst_35 = arith.constant dense<0.000000e+00> : vector<8x8xf32>
    %100 = tpu.matmul %99, %83, %cst_35 {dimension_numbers = #tpu.dot_dimension_numbers<[1], [0], [0], [1], [0, 0, 1, 1], [], []>} : vector<8x8xbf16>, vector<8x8xbf16>, vector<8x8xf32> -> vector<8x8xf32>
    %101 = arith.truncf %100 : vector<8x8xf32> to vector<8x8xbf16>
    %c24 = arith.constant 24 : index
    %c0_36 = arith.constant 0 : index
    %102 = vector.load %arg4[%c24, %c0_36] : memref<32x32xbf16, #tpu.memory_space<vmem>>, vector<8x32xbf16>
    %cst_37 = arith.constant dense<0.000000e+00> : vector<8x32xf32>
    %103 = tpu.matmul %101, %102, %cst_37 {dimension_numbers = #tpu.dot_dimension_numbers<[1], [0], [0], [1], [0, 0, 1, 1], [], []>} : vector<8x8xbf16>, vector<8x32xbf16>, vector<8x32xf32> -> vector<8x32xf32>
    %104 = arith.addf %80, %103 : vector<8x32xf32>
    %c0_38 = arith.constant 0 : index
    %c0_39 = arith.constant 0 : index
    %c0_40 = arith.constant 0 : index
    %105 = vector.load %arg6[%c0_38, %c0_39, %c0_40] : memref<1x8x32xf32, #tpu.memory_space<vmem>>, vector<1x8x32xf32>
    %106 = vector.shape_cast %105 : vector<1x8x32xf32> to vector<8x32xf32>
    %107 = vector.shape_cast %104 : vector<8x32xf32> to vector<1x8x32xf32>
    tpu.vector_store %arg6[%c0_38, %c0_39, %c0_40], %107 {strides = array<i32>} : memref<1x8x32xf32, #tpu.memory_space<vmem>>, vector<1x8x32xf32>,
    return
  }
  func.func @transform_0(%arg0: i32) -> (i32, i32, i32) {
    %c0_i32 = arith.constant 0 : i32
    %c0_i32_0 = arith.constant 0 : i32
    %c0_i32_1 = arith.constant 0 : i32
    return %arg0, %c0_i32, %c0_i32_0 : i32, i32, i32
  }
  func.func @transform_1(%arg0: i32) -> (i32, i32, i32) {
    %c0_i32 = arith.constant 0 : i32
    %c0_i32_0 = arith.constant 0 : i32
    %c0_i32_1 = arith.constant 0 : i32
    return %arg0, %c0_i32, %c0_i32_0 : i32, i32, i32
  }
  func.func @transform_2(%arg0: i32) -> (i32, i32, i32) {
    %c0_i32 = arith.constant 0 : i32
    %c0_i32_0 = arith.constant 0 : i32
    %c0_i32_1 = arith.constant 0 : i32
    return %arg0, %c0_i32, %c0_i32_0 : i32, i32, i32
  }
  func.func @transform_3(%arg0: i32) -> (i32, i32) {
    %c0_i32 = arith.constant 0 : i32
    %c0_i32_0 = arith.constant 0 : i32
    %c0_i32_1 = arith.constant 0 : i32
    return %c0_i32, %c0_i32_0 : i32, i32
  }
  func.func @transform_4(%arg0: i32) -> (i32, i32) {
    %c0_i32 = arith.constant 0 : i32
    %c0_i32_0 = arith.constant 0 : i32
    %c0_i32_1 = arith.constant 0 : i32
    return %c0_i32, %c0_i32_0 : i32, i32
  }
  func.func @transform_5(%arg0: i32) -> (i32, i32, i32) {
    %c0_i32 = arith.constant 0 : i32
    %c0_i32_0 = arith.constant 0 : i32
    %c0_i32_1 = arith.constant 0 : i32
    return %arg0, %c0_i32, %c0_i32_0 : i32, i32, i32
  }
}

module attributes {stable_mosaic.version = 11 : i64} {
  func.func @_ln_qkv_kernel(%arg0: i32, %arg1: memref<16x32xf32, #tpu.memory_space<vmem>>, %arg2: memref<1x32xf32, #tpu.memory_space<vmem>>, %arg3: memref<1x32xf32, #tpu.memory_space<vmem>>, %arg4: memref<32x96xbf16, #tpu.memory_space<vmem>>, %arg5: memref<1x96xf32, #tpu.memory_space<vmem>>, %arg6: memref<16x96xbf16, #tpu.memory_space<vmem>>) attributes {dimension_semantics = [#tpu.dimension_semantics<parallel>], iteration_bounds = array<i64: 1>, scalar_prefetch = 0 : i64, scratch_operands = 0 : i64, tpu.core_type = #tpu.core_type<tc>, window_params = [{transform_indices = @transform_0, window_bounds = array<i64: 16, 32>}, {pipeline_mode = #tpu.pipeline_mode<synchronous>, transform_indices = @transform_1, window_bounds = array<i64: 1, 32>}, {pipeline_mode = #tpu.pipeline_mode<synchronous>, transform_indices = @transform_2, window_bounds = array<i64: 1, 32>}, {pipeline_mode = #tpu.pipeline_mode<synchronous>, transform_indices = @transform_3, window_bounds = array<i64: 32, 96>}, {pipeline_mode = #tpu.pipeline_mode<synchronous>, transform_indices = @transform_4, window_bounds = array<i64: 1, 96>}, {transform_indices = @transform_5, window_bounds = array<i64: 16, 96>}]} {
    %c0 = arith.constant 0 : index
    %c0_0 = arith.constant 0 : index
    %0 = vector.load %arg1[%c0, %c0_0] : memref<16x32xf32, #tpu.memory_space<vmem>>, vector<16x32xf32>
    %c0_1 = arith.constant 0 : index
    %c0_2 = arith.constant 0 : index
    %1 = vector.load %arg2[%c0_1, %c0_2] : memref<1x32xf32, #tpu.memory_space<vmem>>, vector<1x32xf32>
    %c0_3 = arith.constant 0 : index
    %c0_4 = arith.constant 0 : index
    %2 = vector.load %arg3[%c0_3, %c0_4] : memref<1x32xf32, #tpu.memory_space<vmem>>, vector<1x32xf32>
    %cst = arith.constant dense<0.000000e+00> : vector<16xf32>
    %3 = vector.multi_reduction <add>, %0, %cst [1] : vector<16x32xf32> to vector<16xf32>
    %4 = vector.shape_cast %3 : vector<16xf32> to vector<16x1xf32>
    %cst_5 = arith.constant 3.200000e+01 : f32
    %5 = vector.broadcast %cst_5 : f32 to vector<16x1xf32>
    %6 = arith.divf %4, %5 : vector<16x1xf32>
    %7 = vector.broadcast %6 : vector<16x1xf32> to vector<16x32xf32>
    %8 = arith.subf %0, %7 : vector<16x32xf32>
    %9 = arith.mulf %8, %8 : vector<16x32xf32>
    %cst_6 = arith.constant dense<0.000000e+00> : vector<16xf32>
    %10 = vector.multi_reduction <add>, %9, %cst_6 [1] : vector<16x32xf32> to vector<16xf32>
    %11 = vector.shape_cast %10 : vector<16xf32> to vector<16x1xf32>
    %cst_7 = arith.constant 0.0322580636 : f32
    %12 = vector.broadcast %cst_7 : f32 to vector<16x1xf32>
    %13 = arith.mulf %11, %12 : vector<16x1xf32>
    %14 = vector.broadcast %6 : vector<16x1xf32> to vector<16x32xf32>
    %15 = arith.subf %0, %14 : vector<16x32xf32>
    %16 = vector.broadcast %1 : vector<1x32xf32> to vector<16x32xf32>
    %17 = arith.mulf %16, %15 : vector<16x32xf32>
    %18 = math.sqrt %13 : vector<16x1xf32>
    %cst_8 = arith.constant 9.99999997E-7 : f32
    %19 = vector.broadcast %cst_8 : f32 to vector<16x1xf32>
    %20 = arith.addf %18, %19 : vector<16x1xf32>
    %21 = vector.broadcast %20 : vector<16x1xf32> to vector<16x32xf32>
    %22 = arith.divf %17, %21 : vector<16x32xf32>
    %23 = vector.broadcast %2 : vector<1x32xf32> to vector<16x32xf32>
    %24 = arith.addf %22, %23 : vector<16x32xf32>
    %25 = arith.truncf %24 : vector<16x32xf32> to vector<16x32xbf16>
    %c0_9 = arith.constant 0 : index
    %c0_10 = arith.constant 0 : index
    %26 = vector.load %arg4[%c0_9, %c0_10] : memref<32x96xbf16, #tpu.memory_space<vmem>>, vector<32x96xbf16>
    %cst_11 = arith.constant dense<0.000000e+00> : vector<16x96xf32>
    %27 = tpu.matmul %25, %26, %cst_11 {dimension_numbers = #tpu.dot_dimension_numbers<[1], [0], [0], [1], [0, 0, 1, 1], [], []>} : vector<16x32xbf16>, vector<32x96xbf16>, vector<16x96xf32> -> vector<16x96xf32>
    %c0_12 = arith.constant 0 : index
    %c0_13 = arith.constant 0 : index
    %28 = vector.load %arg5[%c0_12, %c0_13] : memref<1x96xf32, #tpu.memory_space<vmem>>, vector<1x96xf32>
    %29 = vector.broadcast %28 : vector<1x96xf32> to vector<16x96xf32>
    %30 = arith.addf %27, %29 : vector<16x96xf32>
    %31 = arith.truncf %30 : vector<16x96xf32> to vector<16x96xbf16>
    %c0_14 = arith.constant 0 : index
    %c0_15 = arith.constant 0 : index
    %32 = vector.load %arg6[%c0_14, %c0_15] : memref<16x96xbf16, #tpu.memory_space<vmem>>, vector<16x96xbf16>
    tpu.vector_store %arg6[%c0_14, %c0_15], %31 {strides = array<i32>} : memref<16x96xbf16, #tpu.memory_space<vmem>>, vector<16x96xbf16>,
    return
  }
  func.func @transform_0(%arg0: i32) -> (i32, i32) {
    %c0_i32 = arith.constant 0 : i32
    %c0_i32_0 = arith.constant 0 : i32
    return %arg0, %c0_i32 : i32, i32
  }
  func.func @transform_1(%arg0: i32) -> (i32, i32) {
    %c0_i32 = arith.constant 0 : i32
    %c0_i32_0 = arith.constant 0 : i32
    %c0_i32_1 = arith.constant 0 : i32
    return %c0_i32, %c0_i32_0 : i32, i32
  }
  func.func @transform_2(%arg0: i32) -> (i32, i32) {
    %c0_i32 = arith.constant 0 : i32
    %c0_i32_0 = arith.constant 0 : i32
    %c0_i32_1 = arith.constant 0 : i32
    return %c0_i32, %c0_i32_0 : i32, i32
  }
  func.func @transform_3(%arg0: i32) -> (i32, i32) {
    %c0_i32 = arith.constant 0 : i32
    %c0_i32_0 = arith.constant 0 : i32
    %c0_i32_1 = arith.constant 0 : i32
    return %c0_i32, %c0_i32_0 : i32, i32
  }
  func.func @transform_4(%arg0: i32) -> (i32, i32) {
    %c0_i32 = arith.constant 0 : i32
    %c0_i32_0 = arith.constant 0 : i32
    %c0_i32_1 = arith.constant 0 : i32
    return %c0_i32, %c0_i32_0 : i32, i32
  }
  func.func @transform_5(%arg0: i32) -> (i32, i32) {
    %c0_i32 = arith.constant 0 : i32
    %c0_i32_0 = arith.constant 0 : i32
    return %arg0, %c0_i32 : i32, i32
  }
}

module attributes {stable_mosaic.version = 11 : i64} {
  func.func @_ln_ffn_residual_kernel(%arg0: i32, %arg1: memref<16x32xf32, #tpu.memory_space<vmem>>, %arg2: memref<1x32xf32, #tpu.memory_space<vmem>>, %arg3: memref<1x32xf32, #tpu.memory_space<vmem>>, %arg4: memref<32x64xbf16, #tpu.memory_space<vmem>>, %arg5: memref<1x64xf32, #tpu.memory_space<vmem>>, %arg6: memref<64x32xbf16, #tpu.memory_space<vmem>>, %arg7: memref<1x32xf32, #tpu.memory_space<vmem>>, %arg8: memref<16x32xf32, #tpu.memory_space<vmem>>) attributes {dimension_semantics = [#tpu.dimension_semantics<parallel>], iteration_bounds = array<i64: 1>, scalar_prefetch = 0 : i64, scratch_operands = 0 : i64, tpu.core_type = #tpu.core_type<tc>, window_params = [{transform_indices = @transform_0, window_bounds = array<i64: 16, 32>}, {pipeline_mode = #tpu.pipeline_mode<synchronous>, transform_indices = @transform_1, window_bounds = array<i64: 1, 32>}, {pipeline_mode = #tpu.pipeline_mode<synchronous>, transform_indices = @transform_2, window_bounds = array<i64: 1, 32>}, {pipeline_mode = #tpu.pipeline_mode<synchronous>, transform_indices = @transform_3, window_bounds = array<i64: 32, 64>}, {pipeline_mode = #tpu.pipeline_mode<synchronous>, transform_indices = @transform_4, window_bounds = array<i64: 1, 64>}, {pipeline_mode = #tpu.pipeline_mode<synchronous>, transform_indices = @transform_5, window_bounds = array<i64: 64, 32>}, {pipeline_mode = #tpu.pipeline_mode<synchronous>, transform_indices = @transform_6, window_bounds = array<i64: 1, 32>}, {transform_indices = @transform_7, window_bounds = array<i64: 16, 32>}]} {
    %c0 = arith.constant 0 : index
    %c0_0 = arith.constant 0 : index
    %0 = vector.load %arg1[%c0, %c0_0] : memref<16x32xf32, #tpu.memory_space<vmem>>, vector<16x32xf32>
    %c0_1 = arith.constant 0 : index
    %c0_2 = arith.constant 0 : index
    %1 = vector.load %arg2[%c0_1, %c0_2] : memref<1x32xf32, #tpu.memory_space<vmem>>, vector<1x32xf32>
    %c0_3 = arith.constant 0 : index
    %c0_4 = arith.constant 0 : index
    %2 = vector.load %arg3[%c0_3, %c0_4] : memref<1x32xf32, #tpu.memory_space<vmem>>, vector<1x32xf32>
    %cst = arith.constant dense<0.000000e+00> : vector<16xf32>
    %3 = vector.multi_reduction <add>, %0, %cst [1] : vector<16x32xf32> to vector<16xf32>
    %4 = vector.shape_cast %3 : vector<16xf32> to vector<16x1xf32>
    %cst_5 = arith.constant 3.200000e+01 : f32
    %5 = vector.broadcast %cst_5 : f32 to vector<16x1xf32>
    %6 = arith.divf %4, %5 : vector<16x1xf32>
    %7 = vector.broadcast %6 : vector<16x1xf32> to vector<16x32xf32>
    %8 = arith.subf %0, %7 : vector<16x32xf32>
    %9 = arith.mulf %8, %8 : vector<16x32xf32>
    %cst_6 = arith.constant dense<0.000000e+00> : vector<16xf32>
    %10 = vector.multi_reduction <add>, %9, %cst_6 [1] : vector<16x32xf32> to vector<16xf32>
    %11 = vector.shape_cast %10 : vector<16xf32> to vector<16x1xf32>
    %cst_7 = arith.constant 0.0322580636 : f32
    %12 = vector.broadcast %cst_7 : f32 to vector<16x1xf32>
    %13 = arith.mulf %11, %12 : vector<16x1xf32>
    %14 = vector.broadcast %6 : vector<16x1xf32> to vector<16x32xf32>
    %15 = arith.subf %0, %14 : vector<16x32xf32>
    %16 = vector.broadcast %1 : vector<1x32xf32> to vector<16x32xf32>
    %17 = arith.mulf %16, %15 : vector<16x32xf32>
    %18 = math.sqrt %13 : vector<16x1xf32>
    %cst_8 = arith.constant 9.99999997E-7 : f32
    %19 = vector.broadcast %cst_8 : f32 to vector<16x1xf32>
    %20 = arith.addf %18, %19 : vector<16x1xf32>
    %21 = vector.broadcast %20 : vector<16x1xf32> to vector<16x32xf32>
    %22 = arith.divf %17, %21 : vector<16x32xf32>
    %23 = vector.broadcast %2 : vector<1x32xf32> to vector<16x32xf32>
    %24 = arith.addf %22, %23 : vector<16x32xf32>
    %25 = arith.truncf %24 : vector<16x32xf32> to vector<16x32xbf16>
    %c0_9 = arith.constant 0 : index
    %c0_10 = arith.constant 0 : index
    %26 = vector.load %arg4[%c0_9, %c0_10] : memref<32x64xbf16, #tpu.memory_space<vmem>>, vector<32x64xbf16>
    %cst_11 = arith.constant dense<0.000000e+00> : vector<16x64xf32>
    %27 = tpu.matmul %25, %26, %cst_11 {dimension_numbers = #tpu.dot_dimension_numbers<[1], [0], [0], [1], [0, 0, 1, 1], [], []>} : vector<16x32xbf16>, vector<32x64xbf16>, vector<16x64xf32> -> vector<16x64xf32>
    %c0_12 = arith.constant 0 : index
    %c0_13 = arith.constant 0 : index
    %28 = vector.load %arg5[%c0_12, %c0_13] : memref<1x64xf32, #tpu.memory_space<vmem>>, vector<1x64xf32>
    %29 = vector.broadcast %28 : vector<1x64xf32> to vector<16x64xf32>
    %30 = arith.addf %27, %29 : vector<16x64xf32>
    %cst_14 = arith.constant 0.000000e+00 : f32
    %31 = vector.broadcast %cst_14 : f32 to vector<16x64xf32>
    %32 = arith.maximumf %30, %31 : vector<16x64xf32>
    %33 = arith.truncf %32 : vector<16x64xf32> to vector<16x64xbf16>
    %c0_15 = arith.constant 0 : index
    %c0_16 = arith.constant 0 : index
    %34 = vector.load %arg6[%c0_15, %c0_16] : memref<64x32xbf16, #tpu.memory_space<vmem>>, vector<64x32xbf16>
    %cst_17 = arith.constant dense<0.000000e+00> : vector<16x32xf32>
    %35 = tpu.matmul %33, %34, %cst_17 {dimension_numbers = #tpu.dot_dimension_numbers<[1], [0], [0], [1], [0, 0, 1, 1], [], []>} : vector<16x64xbf16>, vector<64x32xbf16>, vector<16x32xf32> -> vector<16x32xf32>
    %c0_18 = arith.constant 0 : index
    %c0_19 = arith.constant 0 : index
    %36 = vector.load %arg7[%c0_18, %c0_19] : memref<1x32xf32, #tpu.memory_space<vmem>>, vector<1x32xf32>
    %37 = vector.broadcast %36 : vector<1x32xf32> to vector<16x32xf32>
    %38 = arith.addf %35, %37 : vector<16x32xf32>
    %39 = arith.addf %38, %0 : vector<16x32xf32>
    %c0_20 = arith.constant 0 : index
    %c0_21 = arith.constant 0 : index
    %40 = vector.load %arg8[%c0_20, %c0_21] : memref<16x32xf32, #tpu.memory_space<vmem>>, vector<16x32xf32>
    tpu.vector_store %arg8[%c0_20, %c0_21], %39 {strides = array<i32>} : memref<16x32xf32, #tpu.memory_space<vmem>>, vector<16x32xf32>,
    return
  }
  func.func @transform_0(%arg0: i32) -> (i32, i32) {
    %c0_i32 = arith.constant 0 : i32
    %c0_i32_0 = arith.constant 0 : i32
    return %arg0, %c0_i32 : i32, i32
  }
  func.func @transform_1(%arg0: i32) -> (i32, i32) {
    %c0_i32 = arith.constant 0 : i32
    %c0_i32_0 = arith.constant 0 : i32
    %c0_i32_1 = arith.constant 0 : i32
    return %c0_i32, %c0_i32_0 : i32, i32
  }
  func.func @transform_2(%arg0: i32) -> (i32, i32) {
    %c0_i32 = arith.constant 0 : i32
    %c0_i32_0 = arith.constant 0 : i32
    %c0_i32_1 = arith.constant 0 : i32
    return %c0_i32, %c0_i32_0 : i32, i32
  }
  func.func @transform_3(%arg0: i32) -> (i32, i32) {
    %c0_i32 = arith.constant 0 : i32
    %c0_i32_0 = arith.constant 0 : i32
    %c0_i32_1 = arith.constant 0 : i32
    return %c0_i32, %c0_i32_0 : i32, i32
  }
  func.func @transform_4(%arg0: i32) -> (i32, i32) {
    %c0_i32 = arith.constant 0 : i32
    %c0_i32_0 = arith.constant 0 : i32
    %c0_i32_1 = arith.constant 0 : i32
    return %c0_i32, %c0_i32_0 : i32, i32
  }
  func.func @transform_5(%arg0: i32) -> (i32, i32) {
    %c0_i32 = arith.constant 0 : i32
    %c0_i32_0 = arith.constant 0 : i32
    %c0_i32_1 = arith.constant 0 : i32
    return %c0_i32, %c0_i32_0 : i32, i32
  }
  func.func @transform_6(%arg0: i32) -> (i32, i32) {
    %c0_i32 = arith.constant 0 : i32
    %c0_i32_0 = arith.constant 0 : i32
    %c0_i32_1 = arith.constant 0 : i32
    return %c0_i32, %c0_i32_0 : i32, i32
  }
  func.func @transform_7(%arg0: i32) -> (i32, i32) {
    %c0_i32 = arith.constant 0 : i32
    %c0_i32_0 = arith.constant 0 : i32
    return %arg0, %c0_i32 : i32, i32
  }
}

module attributes {stable_mosaic.version = 11 : i64} {
  func.func @_layernorm_kernel(%arg0: i32, %arg1: memref<16x32xf32, #tpu.memory_space<vmem>>, %arg2: memref<1x32xf32, #tpu.memory_space<vmem>>, %arg3: memref<1x32xf32, #tpu.memory_space<vmem>>, %arg4: memref<16x32xf32, #tpu.memory_space<vmem>>) attributes {dimension_semantics = [#tpu.dimension_semantics<parallel>], iteration_bounds = array<i64: 1>, scalar_prefetch = 0 : i64, scratch_operands = 0 : i64, tpu.core_type = #tpu.core_type<tc>, window_params = [{transform_indices = @transform_0, window_bounds = array<i64: 16, 32>}, {pipeline_mode = #tpu.pipeline_mode<synchronous>, transform_indices = @transform_1, window_bounds = array<i64: 1, 32>}, {pipeline_mode = #tpu.pipeline_mode<synchronous>, transform_indices = @transform_2, window_bounds = array<i64: 1, 32>}, {transform_indices = @transform_3, window_bounds = array<i64: 16, 32>}]} {
    %c0 = arith.constant 0 : index
    %c0_0 = arith.constant 0 : index
    %0 = vector.load %arg1[%c0, %c0_0] : memref<16x32xf32, #tpu.memory_space<vmem>>, vector<16x32xf32>
    %c0_1 = arith.constant 0 : index
    %c0_2 = arith.constant 0 : index
    %1 = vector.load %arg2[%c0_1, %c0_2] : memref<1x32xf32, #tpu.memory_space<vmem>>, vector<1x32xf32>
    %c0_3 = arith.constant 0 : index
    %c0_4 = arith.constant 0 : index
    %2 = vector.load %arg3[%c0_3, %c0_4] : memref<1x32xf32, #tpu.memory_space<vmem>>, vector<1x32xf32>
    %cst = arith.constant dense<0.000000e+00> : vector<16xf32>
    %3 = vector.multi_reduction <add>, %0, %cst [1] : vector<16x32xf32> to vector<16xf32>
    %4 = vector.shape_cast %3 : vector<16xf32> to vector<16x1xf32>
    %cst_5 = arith.constant 3.200000e+01 : f32
    %5 = vector.broadcast %cst_5 : f32 to vector<16x1xf32>
    %6 = arith.divf %4, %5 : vector<16x1xf32>
    %7 = vector.broadcast %6 : vector<16x1xf32> to vector<16x32xf32>
    %8 = arith.subf %0, %7 : vector<16x32xf32>
    %9 = arith.mulf %8, %8 : vector<16x32xf32>
    %cst_6 = arith.constant dense<0.000000e+00> : vector<16xf32>
    %10 = vector.multi_reduction <add>, %9, %cst_6 [1] : vector<16x32xf32> to vector<16xf32>
    %11 = vector.shape_cast %10 : vector<16xf32> to vector<16x1xf32>
    %cst_7 = arith.constant 0.0322580636 : f32
    %12 = vector.broadcast %cst_7 : f32 to vector<16x1xf32>
    %13 = arith.mulf %11, %12 : vector<16x1xf32>
    %14 = vector.broadcast %6 : vector<16x1xf32> to vector<16x32xf32>
    %15 = arith.subf %0, %14 : vector<16x32xf32>
    %16 = vector.broadcast %1 : vector<1x32xf32> to vector<16x32xf32>
    %17 = arith.mulf %16, %15 : vector<16x32xf32>
    %18 = math.sqrt %13 : vector<16x1xf32>
    %cst_8 = arith.constant 9.99999997E-7 : f32
    %19 = vector.broadcast %cst_8 : f32 to vector<16x1xf32>
    %20 = arith.addf %18, %19 : vector<16x1xf32>
    %21 = vector.broadcast %20 : vector<16x1xf32> to vector<16x32xf32>
    %22 = arith.divf %17, %21 : vector<16x32xf32>
    %23 = vector.broadcast %2 : vector<1x32xf32> to vector<16x32xf32>
    %24 = arith.addf %22, %23 : vector<16x32xf32>
    %c0_9 = arith.constant 0 : index
    %c0_10 = arith.constant 0 : index
    %25 = vector.load %arg4[%c0_9, %c0_10] : memref<16x32xf32, #tpu.memory_space<vmem>>, vector<16x32xf32>
    tpu.vector_store %arg4[%c0_9, %c0_10], %24 {strides = array<i32>} : memref<16x32xf32, #tpu.memory_space<vmem>>, vector<16x32xf32>,
    return
  }
  func.func @transform_0(%arg0: i32) -> (i32, i32) {
    %c0_i32 = arith.constant 0 : i32
    %c0_i32_0 = arith.constant 0 : i32
    return %arg0, %c0_i32 : i32, i32
  }
  func.func @transform_1(%arg0: i32) -> (i32, i32) {
    %c0_i32 = arith.constant 0 : i32
    %c0_i32_0 = arith.constant 0 : i32
    %c0_i32_1 = arith.constant 0 : i32
    return %c0_i32, %c0_i32_0 : i32, i32
  }
  func.func @transform_2(%arg0: i32) -> (i32, i32) {
    %c0_i32 = arith.constant 0 : i32
    %c0_i32_0 = arith.constant 0 : i32
    %c0_i32_1 = arith.constant 0 : i32
    return %c0_i32, %c0_i32_0 : i32, i32
  }
  func.func @transform_3(%arg0: i32) -> (i32, i32) {
    %c0_i32 = arith.constant 0 : i32
    %c0_i32_0 = arith.constant 0 : i32
    return %arg0, %c0_i32 : i32, i32
  }
}

</mosaic_0001>

<bundles_post_ra>
// kernel: encoder_forward.9
= control target key start
LH: loop header
LB: loop body
LE: loop exit
PB: predicated region body
PF: predicated region fallthrough
CT: control target
= control target key end

     0   :  { %vm31_vm0 = vcmask 261120   ;;  %v308_v14 = vmov 0.0   ;;  %vm309_vm1 = vmmov 0   ;;  %vm199_vm6 = vcmask 523264   ;;  %s409_s0 = inlined_call_operand.vmem [shape: f32[16,32], index: 0, kind: input, shape index: {}, may-alias: {0,7}]   ;;  %s410_s3 = inlined_call_operand.vmem [shape: bf16[32,64], index: 3, kind: input, shape index: {}]   ;;  %s411_s5 = inlined_call_operand.vmem [shape: bf16[64,32], index: 5, kind: input, shape index: {}]   ;;  %s412_s1 = inlined_call_operand.vmem [shape: f32[1,32], index: 1, kind: input, shape index: {}]   ;;  %s413_s2 = inlined_call_operand.vmem [shape: f32[1,32], index: 2, kind: input, shape index: {}]   ;;  %s414_s4 = inlined_call_operand.vmem [shape: f32[1,64], index: 4, kind: input, shape index: {}]   ;;  %s415_s6 = inlined_call_operand.vmem [shape: f32[1,32], index: 6, kind: input, shape index: {}]   ;;  %s416_s7 = inlined_call_operand.vmem [shape: f32[16,32], index: 7, kind: output, shape index: {}, may-alias: {0,7}]  }
   0x1   :  { %v353_v0 = vld [vmem:[%s409_s0] sm:$0xff]  ;;  %v358_v1 = vld [vmem:[%s409_s0 + $0x8] sm:$0xff]  ;;  %272 = vmatprep.subr.bf16.mxu0 %v308_v14  ;;  %276 = vmatprep.mubr.msk.bf16.mxu0 %vm309_vm1, %v308_v14  ;;  %v298_v46 = vld [vmem:[%s411_s5 + $0x10] sm:$0xff]  }
   0x2   :  { %v32_v2 = vsel %vm31_vm0, %v353_v0, 0.0  ;;  %v35_v3 = vsel %vm31_vm0, %v358_v1, 0.0  ;;  %v294_v15 = vld [vmem:[%s410_s3] sm:$0xff]   ;;  %280 = vmatprep.subr.bf16.mxu1 %v308_v14  ;;  %288 = vmatprep.mubr.msk.bf16.mxu1 %vm309_vm1, %v308_v14  ;;  %v295_v16 = vld [vmem:[%s410_s3 + $0x8] sm:$0xff]   ;;  %v299_v47 = vld [vmem:[%s411_s5 + $0x18] sm:$0xff]  }
   0x3   :  { %33 = vadd.xlane.f32.xlu0 %v32_v2  ;;  %273 = vmatpush3.bf16.msra.mxu0 %v294_v15  ;;  %v296_v17 = vld [vmem:[%s411_s5] sm:$0xff]   ;;  %v297_v18 = vld [vmem:[%s411_s5 + $0x8] sm:$0xff]  }
   0x4   :  { %274 = vmatprep.subr.bf16.mxu0 %v308_v14  ;;  %281 = vmatpush3.bf16.msra.mxu1 %v296_v17  ;;  %v252_v35 = vld [vmem:[%s412_s1] ss:$0 sm:$0xff] }
   0x5   :  { %282 = vmatprep.subr.bf16.mxu1 %v308_v14  ;;  %v253_v41 = vld [vmem:[%s413_s2] ss:$0 sm:$0xff] }
   0x6   :  { %v254_v48 = vld [vmem:[%s414_s4] ss:$0 sm:$0xff] }
   0x7   :  { %36 = vadd.xlane.f32.xlu0 %v35_v3  ;;  %275 = vmatpush3.bf16.msra.mxu0 %v295_v16  ;;  %v258_v58 = vld [vmem:[%s415_s6] ss:$0 sm:$0xff] }
   0x8   :  { %283 = vmatpush3.bf16.msra.mxu1 %v297_v18 }
   0x9   :  { %284 = vmatprep.subr.bf16.mxu1 %v308_v14 }
   0xc   :  { %285 = vmatpush3.bf16.msra.mxu1 %v298_v46 }
   0xd   :  { %286 = vmatprep.subr.bf16.mxu1 %v308_v14 }
  0x10   :  { %287 = vmatpush3.bf16.msra.mxu1 %v299_v47 }
  0x90   :  { %v34_v4 = vpop.xlane.xlu0 %33 }
  0x91   :  { %v39_v5 = vmul.f32 0.03125, %v34_v4 }
  0x93   :  { %v41_v6 = vsub.f32 %v353_v0, %v39_v5 }
  0x94   :  { %v37_v7 = vpop.xlane.xlu0 %36 }
  0x95   :  { %v40_v8 = vmul.f32 0.03125, %v37_v7  ;;  %v43_v9 = vmul.f32 %v41_v6, %v41_v6  ;;  %v59_v37 = vmul.f32 %v252_v35, %v41_v6 }
  0x97   :  { %v42_v10 = vsub.f32 %v358_v1, %v40_v8  ;;  %v45_v11 = vsel %vm31_vm0, %v43_v9, 0.0 }
  0x98   :  { %46 = vadd.xlane.f32.xlu1 %v45_v11 }
  0x99   :  { %v44_v12 = vmul.f32 %v42_v10, %v42_v10  ;;  %v60_v38 = vmul.f32 %v252_v35, %v42_v10 }
  0x9b   :  { %v48_v13 = vsel %vm31_vm0, %v44_v12, 0.0 }
  0x9c   :  { %49 = vadd.xlane.f32.xlu1 %v48_v13 }
 0x125   :  { %v47_v19 = vpop.xlane.xlu1 %46 }
 0x126   :  { %v51_v20 = vmul.f32 0.032258064, %v47_v19 }
 0x128   :  { %300 = vrsqrt.f32 %v51_v20  ;;  %vm63_vm2 = vcmp.eq.f32.partialorder %v51_v20, inf  ;;  %v66_v25 = vand.u32 2147483648, %v51_v20  ;;  %vm65_vm3 = vcmp.eq.f32.partialorder %v51_v20, 0.0 }
 0x129   :  { %v50_v21 = vpop.xlane.xlu1 %49 }
 0x12a   :  { %v52_v22 = vmul.f32 0.032258064, %v50_v21 }
 0x12c   :  { %302 = vrsqrt.f32 %v52_v22  ;;  %vm70_vm4 = vcmp.eq.f32.partialorder %v52_v22, inf  ;;  %v73_v31 = vand.u32 2147483648, %v52_v22  ;;  %vm72_vm5 = vcmp.eq.f32.partialorder %v52_v22, 0.0 }
 0x132   :  { %v301_v23 = vpop.eup %300 }
 0x133   :  { %v62_v24 = vmul.f32 %v301_v23, %v51_v20 }
 0x135   :  { %v64_v26 = vsel %vm63_vm2, %v51_v20, %v62_v24 }
 0x136   :  { %v303_v27 = vpop.eup %302  ;;  %v67_v28 = vsel %vm65_vm3, %v66_v25, %v64_v26 }
 0x137   :  { %v75_v29 = vadd.f32 1e-06, %v67_v28  ;;  %v69_v30 = vmul.f32 %v303_v27, %v52_v22 }
 0x139   :  { %304 = vrcp.f32 %v75_v29  ;;  %v71_v32 = vsel %vm70_vm4, %v52_v22, %v69_v30 }
 0x13a   :  { %v74_v33 = vsel %vm72_vm5, %v73_v31, %v71_v32 }
 0x13b   :  { %v76_v34 = vadd.f32 1e-06, %v74_v33 }
 0x13d   :  { %306 = vrcp.f32 %v76_v34 }
 0x143   :  { %v305_v36 = vpop.eup %304 }
 0x144   :  { %v78_v39 = vmul.f32 %v305_v36, %v59_v37 }
 0x146   :  { %v87_v43 = vadd.f32 %v253_v41, %v78_v39 }
 0x147   :  { %v307_v40 = vpop.eup %306 }
 0x148   :  { %v80_v42 = vmul.f32 %v307_v40, %v60_v38 }
 0x14a   :  { %v88_v44 = vadd.f32 %v253_v41, %v80_v42 }
 0x14c   :  { %v89_v45 = vpack.c.bf16 %v88_v44, %v87_v43 }
 0x14e   :  { %277 = vmatmul.mubr.msk.bf16.vlgmr.msra.gmra.mrb[0].mxu0 %vm31_vm0, %v89_v45 }
 0x221   :  { %v150_v49 = vpop.f32.mrb[0].mxu0 }
 0x222   :  { %v151_v50 = vadd.f32 %v254_v48, %v150_v49  ;;  %v278_v51 = vpop.f32.mrb[1].mxu0 }
 0x223   :  { %v153_v52 = vpop.f32.mrb[2].mxu0 }
 0x224   :  { %v154_v53 = vadd.f32 %v254_v48, %v153_v52  ;;  %v279_v54 = vpop.f32.mrb[3].mxu0  ;;  %v157_v55 = vmax.f32 %v151_v50, 0.0 }
 0x226   :  { %v158_v56 = vmax.f32 %v154_v53, 0.0 }
 0x228   :  { %v159_v57 = vpack.c.bf16 %v158_v56, %v157_v55 }
 0x22a   :  { %289 = vmatmul.mubr.msk.bf16.vlgmr.msra.gmra.mrb[0].mxu1 %vm199_vm6, %v159_v57 }
 0x2fd   :  { %v237_v59 = vpop.f32.mrb[0].mxu1 }
 0x2fe   :  { %v238_v60 = vadd.f32 %v258_v58, %v237_v59  ;;  %v290_v61 = vpop.f32.mrb[1].mxu1 }
 0x2ff   :  { %v240_v62 = vpop.f32.mrb[2].mxu1 }
 0x300   :  { %v244_v63 = vadd.f32 %v238_v60, %v353_v0  ;;  %v241_v2 = vadd.f32 %v258_v58, %v240_v62  ;;  %v291_v3 = vpop.f32.mrb[3].mxu1 }
 0x302   :  { %246 = vst.msk [vmem:[%s416_s7] sm:$0xff] %vm31_vm0, %v244_v63  ;;  %v245_v4 = vadd.f32 %v241_v2, %v358_v1 }
 0x304   :  { %247 = vst.msk [vmem:[%s416_s7 + $0x8] sm:$0xff] %vm31_vm0, %v245_v4 }

// kernel: encoder_forward.7
= control target key start
LH: loop header
LB: loop body
LE: loop exit
PB: predicated region body
PF: predicated region fallthrough
CT: control target
= control target key end

     0   :  { %vm25_vm0 = vcmask 261120   ;;  %v199_v14 = vmov 0.0   ;;  %vm200_vm1 = vmmov 0   ;;  %vm159_vm6 = vcmask 781312   ;;  %s263_s0 = inlined_call_operand.vmem [shape: f32[16,32], index: 0, kind: input, shape index: {}]   ;;  %s264_s3 = inlined_call_operand.vmem [shape: bf16[32,96], index: 3, kind: input, shape index: {}]   ;;  %s265_s1 = inlined_call_operand.vmem [shape: f32[1,32], index: 1, kind: input, shape index: {}]   ;;  %s266_s2 = inlined_call_operand.vmem [shape: f32[1,32], index: 2, kind: input, shape index: {}]   ;;  %s267_s4 = inlined_call_operand.vmem [shape: f32[1,96], index: 4, kind: input, shape index: {}]   ;;  %s268_s5 = inlined_call_operand.vmem [shape: bf16[16,96], index: 5, kind: output, shape index: {}]  }
   0x1   :  { %v21_v0 = vld [vmem:[%s263_s0] sm:$0xff]  ;;  %v22_v1 = vld [vmem:[%s263_s0 + $0x8] sm:$0xff]  ;;  %179 = vmatprep.subr.bf16.mxu0 %v199_v14  ;;  %183 = vmatprep.mubr.msk.bf16.mxu0 %vm200_vm1, %v199_v14 }
   0x2   :  { %v26_v2 = vsel %vm25_vm0, %v21_v0, 0.0  ;;  %v29_v3 = vsel %vm25_vm0, %v22_v1, 0.0  ;;  %v189_v15 = vld [vmem:[%s264_s3] sm:$0xff]   ;;  %v190_v16 = vld [vmem:[%s264_s3 + $0x8] sm:$0xff]  }
   0x3   :  { %27 = vadd.xlane.f32.xlu0 %v26_v2  ;;  %180 = vmatpush3.bf16.msra.mxu0 %v189_v15  ;;  %v166_v33 = vld [vmem:[%s265_s1] ss:$0 sm:$0xff] }
   0x4   :  { %181 = vmatprep.subr.bf16.mxu0 %v199_v14  ;;  %v167_v39 = vld [vmem:[%s266_s2] ss:$0 sm:$0xff] }
   0x5   :  { %v168_v44 = vld [vmem:[%s267_s4] ss:$0 sm:$0xff] }
   0x7   :  { %30 = vadd.xlane.f32.xlu0 %v29_v3  ;;  %182 = vmatpush3.bf16.msra.mxu0 %v190_v16 }
  0x90   :  { %v28_v4 = vpop.xlane.xlu0 %27 }
  0x91   :  { %v33_v5 = vmul.f32 0.03125, %v28_v4 }
  0x93   :  { %v35_v6 = vsub.f32 %v21_v0, %v33_v5 }
  0x94   :  { %v31_v7 = vpop.xlane.xlu0 %30 }
  0x95   :  { %v34_v8 = vmul.f32 0.03125, %v31_v7  ;;  %v37_v9 = vmul.f32 %v35_v6, %v35_v6  ;;  %v53_v35 = vmul.f32 %v166_v33, %v35_v6 }
  0x97   :  { %v36_v10 = vsub.f32 %v22_v1, %v34_v8  ;;  %v39_v11 = vsel %vm25_vm0, %v37_v9, 0.0 }
  0x98   :  { %40 = vadd.xlane.f32.xlu1 %v39_v11 }
  0x99   :  { %v38_v12 = vmul.f32 %v36_v10, %v36_v10  ;;  %v54_v36 = vmul.f32 %v166_v33, %v36_v10 }
  0x9b   :  { %v42_v13 = vsel %vm25_vm0, %v38_v12, 0.0 }
  0x9c   :  { %43 = vadd.xlane.f32.xlu1 %v42_v13 }
 0x125   :  { %v41_v17 = vpop.xlane.xlu1 %40 }
 0x126   :  { %v45_v18 = vmul.f32 0.032258064, %v41_v17 }
 0x128   :  { %191 = vrsqrt.f32 %v45_v18  ;;  %vm57_vm2 = vcmp.eq.f32.partialorder %v45_v18, inf  ;;  %v60_v23 = vand.u32 2147483648, %v45_v18  ;;  %vm59_vm3 = vcmp.eq.f32.partialorder %v45_v18, 0.0 }
 0x129   :  { %v44_v19 = vpop.xlane.xlu1 %43 }
 0x12a   :  { %v46_v20 = vmul.f32 0.032258064, %v44_v19 }
 0x12c   :  { %193 = vrsqrt.f32 %v46_v20  ;;  %vm64_vm4 = vcmp.eq.f32.partialorder %v46_v20, inf  ;;  %v67_v29 = vand.u32 2147483648, %v46_v20  ;;  %vm66_vm5 = vcmp.eq.f32.partialorder %v46_v20, 0.0 }
 0x132   :  { %v192_v21 = vpop.eup %191 }
 0x133   :  { %v56_v22 = vmul.f32 %v192_v21, %v45_v18 }
 0x135   :  { %v58_v24 = vsel %vm57_vm2, %v45_v18, %v56_v22 }
 0x136   :  { %v194_v25 = vpop.eup %193  ;;  %v61_v26 = vsel %vm59_vm3, %v60_v23, %v58_v24 }
 0x137   :  { %v69_v27 = vadd.f32 1e-06, %v61_v26  ;;  %v63_v28 = vmul.f32 %v194_v25, %v46_v20 }
 0x139   :  { %195 = vrcp.f32 %v69_v27  ;;  %v65_v30 = vsel %vm64_vm4, %v46_v20, %v63_v28 }
 0x13a   :  { %v68_v31 = vsel %vm66_vm5, %v67_v29, %v65_v30 }
 0x13b   :  { %v70_v32 = vadd.f32 1e-06, %v68_v31 }
 0x13d   :  { %197 = vrcp.f32 %v70_v32 }
 0x143   :  { %v196_v34 = vpop.eup %195 }
 0x144   :  { %v72_v37 = vmul.f32 %v196_v34, %v53_v35 }
 0x146   :  { %v81_v41 = vadd.f32 %v167_v39, %v72_v37 }
 0x147   :  { %v198_v38 = vpop.eup %197 }
 0x148   :  { %v74_v40 = vmul.f32 %v198_v38, %v54_v36 }
 0x14a   :  { %v82_v42 = vadd.f32 %v167_v39, %v74_v40 }
 0x14c   :  { %v83_v43 = vpack.c.bf16 %v82_v42, %v81_v41 }
 0x14e   :  { %184 = vmatmul.mubr.msk.bf16.vlgmr.msra.gmra.mrb[0].mxu0 %vm25_vm0, %v83_v43 }
 0x221   :  { %v144_v45 = vpop.f32.mrb[0].mxu0 }
 0x222   :  { %v145_v46 = vadd.f32 %v168_v44, %v144_v45  ;;  %v185_v47 = vpop.f32.mrb[1].mxu0 }
 0x223   :  { %v147_v48 = vpop.f32.mrb[2].mxu0 }
 0x224   :  { %v174_v49 = vpack.c.bf16 %v145_v46, %v145_v46  ;;  %v148_v50 = vadd.f32 %v168_v44, %v147_v48  ;;  %v186_v51 = vpop.f32.mrb[3].mxu0 }
 0x226   :  { %160 = vst.msk [vmem:[%s268_s5] sm:$0xf] %vm159_vm6, %v174_v49  ;;  %v175_v52 = vpack.c.bf16 %v148_v50, %v148_v50 }
 0x228   :  { %161 = vst.msk [vmem:[%s268_s5 + $0x4] sm:$0xf] %vm159_vm6, %v175_v52 }

// kernel: encoder_forward.8
= control target key start
LH: loop header
LB: loop body
LE: loop exit
PB: predicated region body
PF: predicated region fallthrough
CT: control target
= control target key end

     0   :  { %s1215_s18 = smov 0   ;;  %s1345_s0 = inlined_call_operand.vmem [shape: bf16[2,8,96], index: 0, kind: input, shape index: {}]   ;;  %s1346_s1 = inlined_call_operand.vmem [shape: f32[2,1,8], index: 1, kind: input, shape index: {}]   ;;  %s1347_s2 = inlined_call_operand.vmem [shape: f32[2,8,32], index: 2, kind: input, shape index: {}, may-alias: {2,5}]   ;;  %s1348_s3 = inlined_call_operand.vmem [shape: bf16[32,32], index: 3, kind: input, shape index: {}]   ;;  %s1349_s4 = inlined_call_operand.vmem [shape: f32[1,32], index: 4, kind: input, shape index: {}]   ;;  %s1350_s5 = inlined_call_operand.vmem [shape: f32[2,8,32], index: 5, kind: output, shape index: {}, may-alias: {2,5}]  }
   0x1 LB: > { %s992_s19 = sadd.s32 4294967295, %s1170_s18   ;;  %p996_p0 = scmp.ge.s32.totalorder %s1170_s18, 1  ;;  %s1170_s18 = sphi %s1215_s18, %s15_s18  }
   0x2   : > { %p203_p1 = scmp.lt.s32.totalorder %s1170_s18, 3 }
   0x4   : > { %p204_p2 = pnand %p996_p0, %p203_p1 }
   0x5   : > { %p236_p3 = scmp.lt.s32.totalorder (!%p204_p2), %s992_s19, 1  ;;  %v1172_v0 = vmov (!%p204_p2), 0.0   ;;  %vm1173_vm0 = vmmov (!%p204_p2), 0   ;;  %s1174_s24 = smov (!%p204_p2), 96   ;;  %vm268_vm1 = vcmask (!%p204_p2), 64512   ;;  %vm340_vm2 = vcmask (!%p204_p2), 1043456  }
   0x6   : > { %207 = sbr.rel (%p204_p2) target bundleno = 2191 (0x88f), region = 40  ;;  %1041 = vmatprep.subr.bf16.mxu0 (!%p204_p2), %v1172_v0  ;;  %1043 = vmatprep.mubr.msk.bf16.mxu0 (!%p204_p2), %vm1173_vm0, %v1172_v0  ;;  %s1175_s25 = smov (!%p204_p2), 64   ;;  %v385_v30 = vld [vmem:[%s1348_s3] sm:$0xf] (!%p204_p2)  ;;  %vm916_vm3 = vcmask (!%p204_p2), 261120  }
   0x7   : > { %1053 = vmatprep.subr.bf16.mxu1 (!%p204_p2), %v1172_v0  ;;  %1055 = vmatprep.mubr.msk.bf16.mxu1 (!%p204_p2), %vm1173_vm0, %v1172_v0  ;;  %s1176_s26 = smov (!%p204_p2), 88   ;;  %s1177_s30 = smov (!%p204_p2), 120   ;;  %v390_v31 = vsel (!%p204_p2), %vm340_vm2, %v385_v30, 0 }
   0x8   : > { %s1178_s6 = smov (!%p204_p2), 80   ;;  %s1179_s7 = smov (!%p204_p2), 112   ;;  %1054 = vmatpush3.bf16.msra.mxu1 (!%p204_p2), %v390_v31 }
   0x9   : > { %1065 = vmatprep.subr.bf16.mxu1 (!%p204_p2), %v1172_v0  ;;  %s1180_s10 = smov (!%p204_p2), 48   ;;  %s1181_s11 = smov (!%p204_p2), 72  }
   0xa   : > { %s1182_s12 = smov (!%p204_p2), 104   ;;  %s1183_s13 = smov (!%p204_p2), 56  }
   0xd   : > { %s1352_s19 = smov (!%p236_p3, %s992_s19), 1 }
   0xe   : > { %s997_s20 = sshll.u32 %s1352_s19, 2  ;;  %s242_s29 = scalar_lea.vmem %s1346_s1, %s1352_s19 }
   0xf   : > { %s239_s23 = scalar_lea.vmem %s1345_s0, %s997_s20  ;;  %v1249_v6 = vld [vmem:[%s242_s29] ss:$0 sm:$0xff]  ;;  %s1184_s20 = smov 40  }
  0x10   : > { %v252_v1 = vld [vmem:[%s239_s23] sm:$0xf]  ;;  %s998_s23 = sshll.u32 %s1352_s19, 3 }
  0x11   : > { %v1235_v2 = vcombine.low %v252_v1, %v252_v1 }
  0x13   : > { %266 = vrot.lane.b32.xlu0 %v1235_v2, %s1174_s24  ;;  %335 = vrot.lane.b32.xlu1 %v1235_v2, %s1175_s25 }
  0x17   : > { %435 = vrot.lane.b32.xlu1 %v1235_v2, %s1176_s26  ;;  %s246_s26 = scalar_lea.vmem %s1347_s2, %s998_s23 }
  0x85   : > { %v267_v3 = vpop.permute.xlu0 %266  ;;  %v336_v13 = vpop.permute.xlu1 %335 }
  0x86   : > { %v273_v4 = vsel %vm268_vm1, %v267_v3, 0  ;;  %v342_v14 = vsel %vm340_vm2, %v336_v13, 0 }
  0x87   : > { %1042 = vmatpush3.bf16.xpose.msra.mxu0 %v273_v4 }
  0x88   : > { %1047 = vmatprep.subr.bf16.mxu0 %v1172_v0 }
  0x89   : > { %v436_v20 = vpop.permute.xlu1 %435 }
  0x8a   : > { %v441_v26 = vsel %vm268_vm1, %v436_v20, 0 }
  0x8e   : > { %1044 = vmatmul.mubr.msk.bf16.vlgmr.msra.gmra.mrb[0].mxu0 %vm268_vm1, %v252_v1 }
  0x8f   : > { %1049 = vmatprep.mubr.msk.bf16.mxu0 %vm1173_vm0, %v1172_v0  ;;  %1048 = vmatpush3.bf16.msra.mxu0 %v342_v14 }
  0x90   : > { %1059 = vmatprep.subr.bf16.mxu0 %v1172_v0 }
 0x161   : > { %v309_v5 = vpop.f32.mrb[0].mxu0 }
 0x162   : > { %v315_v7 = vmul.f32 0.35355338, %v309_v5  ;;  %v1045_v8 = vpop.f32.mrb[1].mxu0 }
 0x163   : > { %v312_v9 = vpop.f32.mrb[2].mxu0 }
 0x164   : > { %v1046_v10 = vpop.f32.mrb[3].mxu0  ;;  %v322_v11 = vadd.f32 %v1249_v6, %v315_v7 }
 0x166   : > { %v323_v12 = vsel %vm268_vm1, %v322_v11, -inf }
 0x167   : > { %324 = vmax.xlane.f32.xlu0 %v323_v12 }
 0x1f4   : > { %v325_v15 = vpop.xlane.xlu0 %324 }
 0x1f5   : > { %v326_v16 = vsub.f32 %v322_v11, %v325_v15  ;;  %v546_v15 = vld [vmem:[%s1348_s3 + $0x4] sm:$0xf] }
 0x1f7   : > { %v327_v17 = vmul.f32 1.442695, %v326_v16  ;;  %v551_v16 = vsel %vm340_vm2, %v546_v15, 0 }
 0x1f9   : > { %1148 = vpow2.f32 %v327_v17 }
 0x203   : > { %v1149_v18 = vpop.eup %1148 }
 0x204   : > { %v329_v19 = vsel %vm268_vm1, %v1149_v18, 0.0 }
 0x205   : > { %330 = vadd.xlane.f32.xlu1 %v329_v19 }
 0x216   : > { %433 = vrot.lane.b32.xlu1 %v1235_v2, %s1177_s30 }
 0x21a   : > { %596 = vrot.lane.b32.xlu1 %v1235_v2, %s1178_s6  ;;  %s250_s6 = scalar_lea.vmem %s1350_s5, %s998_s23 }
 0x21e   : > { %594 = vrot.lane.b32.xlu1 %v1235_v2, %s1179_s7 }
 0x292   : > { %v331_v21 = vpop.xlane.xlu1 %330 }
 0x293   : > { %1150 = vrcp.f32 %v331_v21 }
 0x296   : > { %v434_v24 = vpop.permute.xlu1 %433 }
 0x29a   : > { %v597_v27 = vpop.permute.xlu1 %596 }
 0x29b   : > { %v602_v28 = vsel %vm268_vm1, %v597_v27, 0 }
 0x29d   : > { %v1151_v22 = vpop.eup %1150 }
 0x29e   : > { %v333_v23 = vmul.f32 %v1151_v22, %v1149_v18  ;;  %v595_v29 = vpop.permute.xlu1 %594 }
 0x2a0   : > { %v334_v25 = vpack.c.bf16 %v333_v23, %v333_v23 }
 0x2a2   : > { %1050 = vmatmul.mubr.msk.bf16.vlgmr.msra.gmra.mrb[4].mxu0 %vm268_vm1, %v334_v25 }
 0x2a3   : > { %1060 = vmatpush3.bf16.xpose.msra.mxu0 %v441_v26  ;;  %1061 = vmatprep.mubr.msk.bf16.mxu0 %vm1173_vm0, %v1172_v0 }
 0x2a4   : > { %1077 = vmatprep.subr.bf16.mxu0 %v1172_v0 }
 0x2aa   : > { %1062 = vmatmul.mubr.msk.bf16.vlgmr.msra.gmra.mrb[8].mxu0 %vm268_vm1, %v434_v24 }
 0x2ab   : > { %1078 = vmatpush3.bf16.xpose.msra.mxu0 %v602_v28  ;;  %1079 = vmatprep.mubr.msk.bf16.mxu0 %vm1173_vm0, %v1172_v0  ;;  %v707_v28 = vld [vmem:[%s1348_s3 + $0x8] sm:$0xf] }
 0x2ac   : > { %1083 = vmatprep.subr.bf16.mxu0 %v1172_v0 }
 0x2b2   : > { %1080 = vmatmul.mubr.msk.bf16.vlgmr.msra.gmra.mrb[12].mxu0 %vm268_vm1, %v595_v29 }
 0x2b3   : > { %1085 = vmatprep.mubr.msk.bf16.mxu0 %vm1173_vm0, %v1172_v0 }
 0x375   : > { %v378_v32 = vpop.f32.mrb[4].mxu0 }
 0x376   : > { %v384_v33 = vpack.c.bf16 %v378_v32, %v378_v32  ;;  %v1051_v34 = vpop.f32.mrb[5].mxu0  ;;  %v712_v32 = vsel %vm340_vm2, %v707_v28, 0 }
 0x377   : > { %v381_v35 = vpop.f32.mrb[6].mxu0 }
 0x378   : > { %v1052_v36 = vpop.f32.mrb[7].mxu0  ;;  %1056 = vmatmul.mubr.msk.bf16.vlgmr.msra.gmra.mrb[0].mxu1 %vm268_vm1, %v384_v33 }
 0x379   : > { %1067 = vmatprep.mubr.msk.bf16.mxu1 %vm1173_vm0, %v1172_v0 }
 0x37d   : > { %v477_v37 = vpop.f32.mrb[8].mxu0 }
 0x37e   : > { %v1063_v38 = vpop.f32.mrb[9].mxu0  ;;  %v483_v48 = vmul.f32 0.35355338, %v477_v37 }
 0x37f   : > { %v480_v39 = vpop.f32.mrb[10].mxu0 }
 0x380   : > { %v1064_v40 = vpop.f32.mrb[11].mxu0  ;;  %v484_v49 = vadd.f32 %v1249_v6, %v483_v48 }
 0x382   : > { %v485_v50 = vsel %vm268_vm1, %v484_v49, -inf }
 0x385   : > { %v638_v41 = vpop.f32.mrb[12].mxu0 }
 0x386   : > { %v644_v42 = vmul.f32 0.35355338, %v638_v41  ;;  %v1081_v43 = vpop.f32.mrb[13].mxu0 }
 0x387   : > { %v641_v44 = vpop.f32.mrb[14].mxu0 }
 0x388   : > { %v1082_v45 = vpop.f32.mrb[15].mxu0  ;;  %v645_v46 = vadd.f32 %v1249_v6, %v644_v42  ;;  %v868_v44 = vld [vmem:[%s1348_s3 + $0xc] sm:$0xf] }
 0x38a   : > { %v646_v47 = vsel %vm268_vm1, %v645_v46, -inf }
 0x38b   : > { %647 = vmax.xlane.f32.xlu0 %v646_v47  ;;  %v873_v47 = vsel %vm340_vm2, %v868_v44, 0 }
 0x3a1   : > { %658 = vrot.lane.b32.xlu0 %v1235_v2, %s1180_s10 }
 0x3a5   : > { %757 = vrot.lane.b32.xlu0 %v1235_v2, %s1181_s11 }
 0x3a9   : > { %755 = vrot.lane.b32.xlu0 %v1235_v2, %s1182_s12 }
 0x3c8   : > { %486 = vmax.xlane.f32.xlu0 %v485_v50 }
 0x418   : > { %v648_v51 = vpop.xlane.xlu0 %647 }
 0x419   : > { %v649_v52 = vsub.f32 %v645_v46, %v648_v51 }
 0x41b   : > { %v650_v53 = vmul.f32 1.442695, %v649_v52  ;;  %v254_v52 = vld [vmem:[%s246_s26] sm:$0xff] }
 0x41c   : > { %v659_v54 = vpop.permute.xlu0 %658 }
 0x41d   : > { %1152 = vpow2.f32 %v650_v53  ;;  %v664_v55 = vsel %vm340_vm2, %v659_v54, 0  ;;  %v1000_v53 = vld [vmem:[%s1349_s4] ss:$0 sm:$0xff] }
 0x41e   : > { %1084 = vmatpush3.bf16.msra.mxu0 %v664_v55  ;;  %v262_v54 = vadd.f32 %v1000_v53, %v254_v52 }
 0x41f   : > { %1095 = vmatprep.subr.bf16.mxu0 %v1172_v0 }
 0x420   : > { %v758_v58 = vpop.permute.xlu0 %757 }
 0x421   : > { %v763_v7 = vsel %vm268_vm1, %v758_v58, 0 }
 0x424   : > { %v756_v59 = vpop.permute.xlu0 %755 }
 0x427   : > { %v1153_v56 = vpop.eup %1152 }
 0x428   : > { %v652_v57 = vsel %vm268_vm1, %v1153_v56, 0.0 }
 0x429   : > { %653 = vadd.xlane.f32.xlu1 %v652_v57 }
 0x455   : > { %v487_v60 = vpop.xlane.xlu0 %486 }
 0x456   : > { %v488_v61 = vsub.f32 %v484_v49, %v487_v60 }
 0x458   : > { %v489_v62 = vmul.f32 1.442695, %v488_v61 }
 0x45a   : > { %1154 = vpow2.f32 %v489_v62 }
 0x464   : > { %v1155_v63 = vpop.eup %1154 }
 0x465   : > { %v491_v1 = vsel %vm268_vm1, %v1155_v63, 0.0 }
 0x466   : > { %492 = vadd.xlane.f32.xlu1 %v491_v1 }
 0x477   : > { %497 = vrot.lane.b32.xlu1 %v1235_v2, %s1183_s13 }
 0x4b6   : > { %v654_v3 = vpop.xlane.xlu1 %653 }
 0x4b7   : > { %1156 = vrcp.f32 %v654_v3 }
 0x4c1   : > { %v1157_v4 = vpop.eup %1156 }
 0x4c2   : > { %v656_v5 = vmul.f32 %v1157_v4, %v1153_v56 }
 0x4c4   : > { %v657_v8 = vpack.c.bf16 %v656_v5, %v656_v5 }
 0x4c6   : > { %1086 = vmatmul.mubr.msk.bf16.vlgmr.msra.gmra.mrb[16].mxu0 %vm268_vm1, %v657_v8 }
 0x4c7   : > { %1096 = vmatpush3.bf16.xpose.msra.mxu0 %v763_v7  ;;  %1097 = vmatprep.mubr.msk.bf16.mxu0 %vm1173_vm0, %v1172_v0 }
 0x4ce   : > { %1098 = vmatmul.mubr.msk.bf16.vlgmr.msra.gmra.mrb[20].mxu0 %vm268_vm1, %v756_v59 }
 0x4f3   : > { %v493_v9 = vpop.xlane.xlu1 %492 }
 0x4f4   : > { %1158 = vrcp.f32 %v493_v9 }
 0x4f7   : > { %v498_v10 = vpop.permute.xlu1 %497 }
 0x4f8   : > { %v503_v11 = vsel %vm340_vm2, %v498_v10, 0 }
 0x4f9   : > { %1066 = vmatpush3.bf16.msra.mxu1 %v503_v11 }
 0x4fa   : > { %1071 = vmatprep.subr.bf16.mxu1 %v1172_v0 }
 0x4fe   : > { %v1159_v12 = vpop.eup %1158 }
 0x4ff   : > { %v495_v13 = vmul.f32 %v1159_v12, %v1155_v63 }
 0x501   : > { %v496_v14 = vpack.c.bf16 %v495_v13, %v495_v13 }
 0x503   : > { %1068 = vmatmul.mubr.msk.bf16.vlgmr.msra.gmra.mrb[4].mxu1 %vm268_vm1, %v496_v14 }
 0x504   : > { %1073 = vmatprep.mubr.msk.bf16.mxu1 %vm1173_vm0, %v1172_v0  ;;  %1072 = vmatpush3.bf16.msra.mxu1 %v551_v16 }
 0x505   : > { %1089 = vmatprep.subr.bf16.mxu1 %v1172_v0 }
 0x599   : > { %v700_v17 = vpop.f32.mrb[16].mxu0 }
 0x59a   : > { %v1087_v18 = vpop.f32.mrb[17].mxu0 }
 0x59b   : > { %v703_v19 = vpop.f32.mrb[18].mxu0 }
 0x59c   : > { %v1088_v20 = vpop.f32.mrb[19].mxu0 }
 0x5a1   : > { %v799_v21 = vpop.f32.mrb[20].mxu0 }
 0x5a2   : > { %v805_v22 = vmul.f32 0.35355338, %v799_v21  ;;  %v1099_v23 = vpop.f32.mrb[21].mxu0 }
 0x5a3   : > { %v802_v24 = vpop.f32.mrb[22].mxu0 }
 0x5a4   : > { %v1100_v25 = vpop.f32.mrb[23].mxu0  ;;  %v806_v26 = vadd.f32 %v1249_v6, %v805_v22  ;;  %v706_v6 = vpack.c.bf16 %v700_v17, %v700_v17 }
 0x5a6   : > { %v807_v27 = vsel %vm268_vm1, %v806_v26, -inf }
 0x5a7   : > { %808 = vmax.xlane.f32.xlu1 %v807_v27 }
 0x5d6   : > { %v539_v29 = vpop.f32.mrb[4].mxu1 }
 0x5d7   : > { %v545_v30 = vpack.c.bf16 %v539_v29, %v539_v29  ;;  %v1069_v31 = vpop.f32.mrb[5].mxu1 }
 0x5d8   : > { %v542_v33 = vpop.f32.mrb[6].mxu1 }
 0x5d9   : > { %v1070_v34 = vpop.f32.mrb[7].mxu1  ;;  %1074 = vmatmul.mubr.msk.bf16.vlgmr.msra.gmra.mrb[0].mxu1 %vm268_vm1, %v545_v30 }
 0x5da   : > { %1090 = vmatpush3.bf16.msra.mxu1 %v712_v32  ;;  %1091 = vmatprep.mubr.msk.bf16.mxu1 %vm1173_vm0, %v1172_v0 }
 0x5db   : > { %1101 = vmatprep.subr.bf16.mxu1 %v1172_v0 }
 0x5e5   : > { %1092 = vmatmul.mubr.msk.bf16.vlgmr.msra.gmra.mrb[0].mxu1 %vm268_vm1, %v706_v6 }
 0x5e6   : > { %1103 = vmatprep.mubr.msk.bf16.mxu1 %vm1173_vm0, %v1172_v0 }
 0x634   : > { %v809_v35 = vpop.xlane.xlu1 %808 }
 0x635   : > { %v810_v36 = vsub.f32 %v806_v26, %v809_v35 }
 0x637   : > { %v811_v37 = vmul.f32 1.442695, %v810_v36 }
 0x639   : > { %1160 = vpow2.f32 %v811_v37 }
 0x643   : > { %v1161_v38 = vpop.eup %1160 }
 0x644   : > { %v813_v39 = vsel %vm268_vm1, %v1161_v38, 0.0 }
 0x645   : > { %814 = vadd.xlane.f32.xlu0 %v813_v39 }
 0x65b   : > { %819 = vrot.lane.b32.xlu0 %v1235_v2, %s1184_s20 }
 0x6d2   : > { %v815_v40 = vpop.xlane.xlu0 %814 }
 0x6d3   : > { %1162 = vrcp.f32 %v815_v40 }
 0x6d6   : > { %v820_v41 = vpop.permute.xlu0 %819 }
 0x6d7   : > { %v825_v42 = vsel %vm340_vm2, %v820_v41, 0 }
 0x6d8   : > { %1102 = vmatpush3.bf16.msra.mxu1 %v825_v42 }
 0x6d9   : > { %1107 = vmatprep.subr.bf16.mxu1 %v1172_v0 }
 0x6dd   : > { %v1163_v43 = vpop.eup %1162 }
 0x6de   : > { %v817_v45 = vmul.f32 %v1163_v43, %v1161_v38 }
 0x6e0   : > { %v818_v46 = vpack.c.bf16 %v817_v45, %v817_v45 }
 0x6e2   : > { %1104 = vmatmul.mubr.msk.bf16.vlgmr.msra.gmra.mrb[8].mxu1 %vm268_vm1, %v818_v46 }
 0x6e3   : > { %1108 = vmatpush3.bf16.msra.mxu1 %v873_v47  ;;  %1109 = vmatprep.mubr.msk.bf16.mxu1 %vm1173_vm0, %v1172_v0 }
 0x7b5   : > { %v861_v2 = vpop.f32.mrb[8].mxu1 }
 0x7b6   : > { %v867_v48 = vpack.c.bf16 %v861_v2, %v861_v2  ;;  %v1105_v49 = vpop.f32.mrb[9].mxu1 }
 0x7b7   : > { %v864_v50 = vpop.f32.mrb[10].mxu1 }
 0x7b8   : > { %v1106_v51 = vpop.f32.mrb[11].mxu1  ;;  %1110 = vmatmul.mubr.msk.bf16.vlgmr.msra.gmra.mrb[0].mxu1 %vm268_vm1, %v867_v48 }
 0x88b   : > { %v909_v0 = vpop.f32.mrb[0].mxu1 }
 0x88c   : > { %v1113_v55 = vadd.f32 %v909_v0, %v262_v54  ;;  %v1111_v56 = vpop.f32.mrb[1].mxu1 }
 0x88d   : > { %v912_v57 = vpop.f32.mrb[2].mxu1 }
 0x88e   : > { %917 = vst.msk [vmem:[%s250_s6] sm:$0xff] %vm916_vm3, %v1113_v55  ;;  %v1112_v58 = vpop.f32.mrb[3].mxu1 }
 0x88f PF: > { %s15_s18 = sadd.s32 1, %s1170_s18  }
 0x890   : > { %p12_p4 = scmp.ge.s32.totalorder %s15_s18, 4  }
 0x892   :  { %14 = sbr.rel (!%p12_p4) target bundleno = 1 (0x1), region = 76 }

// kernel: encoder_forward.13
= control target key start
LH: loop header
LB: loop body
LE: loop exit
PB: predicated region body
PF: predicated region fallthrough
CT: control target
= control target key end

     0   :  { %vm19_vm0 = vcmask 261120   ;;  %s185_s0 = inlined_call_operand.vmem [shape: f32[16,32], index: 0, kind: input, shape index: {}]   ;;  %s186_s1 = inlined_call_operand.vmem [shape: f32[1,32], index: 1, kind: input, shape index: {}]   ;;  %s187_s2 = inlined_call_operand.vmem [shape: f32[1,32], index: 2, kind: input, shape index: {}]   ;;  %s188_s3 = inlined_call_operand.hbm [shape: f32[16,32], index: 3, kind: output, shape index: {}]  }
   0x1   :  { %v15_v0 = vld [vmem:[%s185_s0] sm:$0xff]  ;;  %v16_v1 = vld [vmem:[%s185_s0 + $0x8] sm:$0xff] }
   0x2   :  { %v20_v2 = vsel %vm19_vm0, %v15_v0, 0.0 }
   0x3   :  { %8 = vsyncpa [#allocation3], 0  ;;  %21 = vadd.xlane.f32.xlu0 %v20_v2  ;;  %v23_v3 = vsel %vm19_vm0, %v16_v1, 0.0  ;;  %v95_v30 = vld [vmem:[%s186_s1] ss:$0 sm:$0xff]  ;;  %s132_s19 = smov [#allocation2]  }
   0x4   :  { %v96_v33 = vld [vmem:[%s187_s2] ss:$0 sm:$0xff]  ;;  %s84_s20 = sshll.u32 %s132_s19, 4  ;;  %s85_s20 = int_to_ptr.vmem [resolvable:$true] %s84_s20 }
   0x5   :  { %s108_s1 = scalar_lea.vmem %s85_s20, 256  ;;  %p113_p1 = scmp.lt.s32.totalorder %s85_s20, %s85_s20 }
   0x6   :  { %p109_p0 = scmp.ne.s32.totalorder %s85_s20, %s108_s1  ;;  %p114_p2 = scmp.lt.s32.totalorder %s108_s1, %s108_s1 }
   0x7   :  { %24 = vadd.xlane.f32.xlu0 %v23_v3 }
   0x8   :  { %p115_p3 = por %p114_p2, %p113_p1 }
   0xa   :  { %p116_p4 = pnand %p115_p3, %p109_p0 }
  0x90   :  { %v22_v4 = vpop.xlane.xlu0 %21 }
  0x91   :  { %v27_v5 = vmul.f32 0.03125, %v22_v4 }
  0x93   :  { %v29_v6 = vsub.f32 %v15_v0, %v27_v5 }
  0x94   :  { %v25_v7 = vpop.xlane.xlu0 %24 }
  0x95   :  { %v28_v8 = vmul.f32 0.03125, %v25_v7  ;;  %v31_v9 = vmul.f32 %v29_v6, %v29_v6  ;;  %v47_v31 = vmul.f32 %v95_v30, %v29_v6 }
  0x97   :  { %v30_v10 = vsub.f32 %v16_v1, %v28_v8  ;;  %v33_v11 = vsel %vm19_vm0, %v31_v9, 0.0 }
  0x98   :  { %34 = vadd.xlane.f32.xlu1 %v33_v11 }
  0x99   :  { %v32_v12 = vmul.f32 %v30_v10, %v30_v10  ;;  %v48_v35 = vmul.f32 %v95_v30, %v30_v10 }
  0x9b   :  { %v36_v13 = vsel %vm19_vm0, %v32_v12, 0.0 }
  0x9c   :  { %37 = vadd.xlane.f32.xlu1 %v36_v13 }
 0x125   :  { %v35_v14 = vpop.xlane.xlu1 %34 }
 0x126   :  { %v39_v15 = vmul.f32 0.032258064, %v35_v14 }
 0x128   :  { %100 = vrsqrt.f32 %v39_v15  ;;  %vm51_vm1 = vcmp.eq.f32.partialorder %v39_v15, inf  ;;  %v54_v20 = vand.u32 2147483648, %v39_v15  ;;  %vm53_vm2 = vcmp.eq.f32.partialorder %v39_v15, 0.0 }
 0x129   :  { %v38_v16 = vpop.xlane.xlu1 %37 }
 0x12a   :  { %v40_v17 = vmul.f32 0.032258064, %v38_v16 }
 0x12c   :  { %102 = vrsqrt.f32 %v40_v17  ;;  %vm58_vm3 = vcmp.eq.f32.partialorder %v40_v17, inf  ;;  %v61_v26 = vand.u32 2147483648, %v40_v17  ;;  %vm60_vm4 = vcmp.eq.f32.partialorder %v40_v17, 0.0 }
 0x132   :  { %v101_v18 = vpop.eup %100 }
 0x133   :  { %v50_v19 = vmul.f32 %v101_v18, %v39_v15 }
 0x135   :  { %v52_v21 = vsel %vm51_vm1, %v39_v15, %v50_v19 }
 0x136   :  { %v103_v22 = vpop.eup %102  ;;  %v55_v23 = vsel %vm53_vm2, %v54_v20, %v52_v21 }
 0x137   :  { %v63_v24 = vadd.f32 1e-06, %v55_v23  ;;  %v57_v25 = vmul.f32 %v103_v22, %v40_v17 }
 0x139   :  { %104 = vrcp.f32 %v63_v24  ;;  %v59_v27 = vsel %vm58_vm3, %v40_v17, %v57_v25 }
 0x13a   :  { %v62_v28 = vsel %vm60_vm4, %v61_v26, %v59_v27 }
 0x13b   :  { %v64_v29 = vadd.f32 1e-06, %v62_v28 }
 0x13d   :  { %106 = vrcp.f32 %v64_v29 }
 0x143   :  { %v105_v32 = vpop.eup %104 }
 0x144   :  { %v66_v34 = vmul.f32 %v105_v32, %v47_v31 }
 0x146   :  { %v75_v36 = vadd.f32 %v96_v33, %v66_v34 }
 0x147   :  { %v107_v37 = vpop.eup %106 }
 0x148   :  { %v68_v38 = vmul.f32 %v107_v37, %v48_v35  ;;  %77 = vst.msk [vmem:[#allocation2] sm:$0xff] %vm19_vm0, %v75_v36 }
 0x14a   :  { %v76_v39 = vadd.f32 %v96_v33, %v68_v38 }
 0x14c   :  { %78 = vst.msk [vmem:[#allocation2 + $0x8] sm:$0xff] %vm19_vm0, %v76_v39 }
 0x14d   :  { %119 = shalt.err (!%p116_p4)
}
 0x14e   :  { %s120_s22 = scalar_lea.hbm %s188_s3, 256 }
 0x14f   :  { %p121_p5 = scmp.ne.s32.totalorder %s188_s3, %s120_s22  ;;  %p124_p6 = scmp.lt.u32.totalorder %s120_s22, %s188_s3 }
 0x151   :  { %p126_p7 = pnand %p124_p6, %p121_p5 }
 0x153   :  { %129 = shalt.err (!%p126_p7)
}
 0x154   :  { %s133_s27 = smov 128   ;;  %s134_s28 = smov 8  }
 0x155   :  { %90 = dma.vmem_to_hbm [thread:$0]  %s85_s20, 256, %s188_s3, [#allocation3], %s133_s27, %s133_s27, %s134_s28  }
 0x156   :  { %130 = dma.done.wait [#allocation3], 256  }
 0x157   :  { %131 = vsyncadd [#allocation3], 4294967040 }
 0x158   :  { %94 = vsyncpa [#allocation3], 1 }

</bundles_post_ra>
